<compile_context>
chip_gen: v6e
topology: v6e:2x2x1
jax: 0.10.0
libtpu: 0.0.40
codegen_flags: <defaults>
</compile_context>

<pallas_src>
import functools
import math

import jax
import jax.numpy as jnp
from jax.experimental import pallas as pl
from jax.experimental.pallas import tpu as pltpu

SELU_ALPHA = 1.6732632423543772
SELU_SCALE = 1.0507009873554805


def _selu(x):
    # safe form (no overflow for large x); exp(x)-1 instead of expm1 to stay on
    # ops with guaranteed Mosaic lowering (negligible drift at f32).
    return SELU_SCALE * jnp.where(
        x > 0.0, x, SELU_ALPHA * (jnp.exp(jnp.minimum(x, 0.0)) - 1.0)
    )


# ----------------------------------------------------------------------------
# Single fused Pallas kernel: L-layer LSTM + mu/sigma SELU heads + reparam.
# Gate column order inside the kernel is (i, f, o, g).
# ----------------------------------------------------------------------------
def encoder_fused_kernel(num_layers, H, latent, Bp, eps_ref, x_ref, *rest):
    nw = 3 * num_layers
    weight_refs = rest[:nw]                       # (w_ih_t, w_hh_t, b) per layer
    w_head_ref = rest[nw]                         # (2H*num_layers, 2L)
    b_head_ref = rest[nw + 1]                     # (1, 2L)
    noise_ref = rest[nw + 2]                      # (Bp, L)
    out_ref = rest[nw + 3]                        # (Bp, 3L) packed [z | mu | log_sigma]
    gpre_sc, hseq_a, hseq_b = rest[nw + 4:]       # (S*Bp,4H), (S*Bp,H), (S*Bp,H)

    SBp = x_ref.shape[0]
    S = SBp // Bp
    hseq_bufs = (hseq_a, hseq_b)

    # per-layer split-K accumulation of the fused mu/sigma head matmul
    head_acc = jnp.zeros((Bp, 2 * latent), jnp.float32)

    for layer in range(num_layers):
        w_ih = weight_refs[3 * layer]             # (in_dim, 4H)
        w_hh = weight_refs[3 * layer + 1]         # (H, 4H)
        b = weight_refs[3 * layer + 2]            # (1, 4H)

        # ---- hoisted input projection: all timesteps in one matmul, no reshape ----
        if layer == 0:
            flat_in = x_ref[...]                              # (S*Bp, E)
        else:
            flat_in = hseq_bufs[(layer - 1) % 2][...]         # (S*Bp, H) prev layer
        gpre_sc[...] = (
            jnp.dot(flat_in, w_ih[...], preferred_element_type=jnp.float32)
            + b[...]
        )

        hseq_out = hseq_bufs[layer % 2]

        # ---- serial recurrence: h/c carried in vregs, only h @ W_hh per step ----
        h = jnp.zeros((Bp, H), jnp.float32)
        c = jnp.zeros((Bp, H), jnp.float32)
        w_hh_v = w_hh[...]                                    # invariant across steps
        # TODO(synk): pin W_hh in the MXU across the timestep loop with
        # pltpu.matmul_push_rhs / matmul_acc_lhs / matmul_pop (and seed the MRB
        # with gpre on v7x) once the explicit-MXU path is worth the complexity;
        # at these sizes jnp.dot already keeps the small weight resident.
        for t in range(S):                                    # static S -> static slices
            row = t * Bp                                      # multiple of 8 (sublane aligned)
            gates = gpre_sc[row:row + Bp, :] + jnp.dot(
                h, w_hh_v, preferred_element_type=jnp.float32
            )                                                 # (Bp, 4H), order (i, f, o, g)
            sig = jax.nn.sigmoid(gates[:, : 3 * H])
            g = jnp.tanh(gates[:, 3 * H:])
            i = sig[:, :H]
            f = sig[:, H: 2 * H]
            o = sig[:, 2 * H: 3 * H]
            c = f * c + i * g
            h = o * jnp.tanh(c)
            hseq_out[row:row + Bp, :] = h

        # ---- fold this layer's final (h, c) into the head matmul (split-K) ----
        # Row layout of w_head matches torch C = flatten(transpose(cat((h,c),2),0,1)):
        # per layer block [h_l rows | c_l rows], each of height H.
        base = 2 * H * layer
        head_acc = head_acc + jnp.dot(
            h, w_head_ref[base: base + H, :], preferred_element_type=jnp.float32
        )
        head_acc = head_acc + jnp.dot(
            c, w_head_ref[base + H: base + 2 * H, :],
            preferred_element_type=jnp.float32,
        )

    # ---- fused mu/sigma head + reparameterization ----
    head = head_acc + b_head_ref[...]                         # (Bp, 2L)
    mu = _selu(head[:, :latent])
    log_sigma = _selu(head[:, latent:])
    sd = jnp.exp(0.5 * log_sigma)
    eps = eps_ref[0]
    z = mu + (eps * noise_ref[...]) * sd
    # single lane-packed output store; split into z / mu / log_sigma in the wrapper
    out_ref[...] = jnp.concatenate([z, mu, log_sigma], axis=1)


def encoder_forward(params, X, noise, eps):
    """X: (B, S) int32 token ids; noise: (B, L) standard normal; eps: python/JAX scalar."""
    B, S = X.shape
    num_layers = len(params["lstm"])
    H = params["lstm"][0]["w_hh_t"].shape[0]
    L = params["w_head_t"].shape[1] // 2

    Bp = max(8, ((B + 7) // 8) * 8)               # pad batch to sublane multiple

    # Time-major embedding gather: (S, B, E) directly, no (B,S,E) transpose copy.
    # TODO(synk): at realistic S*B*E fuse the gather into the kernel
    # (PrefetchScalarGridSpec + pl.Element row-gather on the embed table) to
    # avoid the HBM round trip of this activation tensor (biggest win on v5e).
    x = jnp.take(params["embed"], X.T, axis=0).astype(jnp.float32)   # (S, B, E)
    if Bp != B:
        x = jnp.pad(x, ((0, 0), (0, Bp - B), (0, 0)))
        noise_p = jnp.pad(noise, ((0, Bp - B), (0, 0)))
    else:
        noise_p = noise
    E = x.shape[-1]
    x2d = x.reshape(S * Bp, E)                    # contiguous flatten in the wrapper

    eps_arr = jnp.asarray([eps], jnp.float32)     # SMEM scalar (no recompile per eps)

    inputs = [eps_arr, x2d]
    for layer in params["lstm"]:
        inputs += [layer["w_ih_t"], layer["w_hh_t"], layer["b"]]
    inputs += [params["w_head_t"], params["b_head"], noise_p]
    # TODO(synk): on v6e/v7x cast the LSTM/head weights and matmul LHS to bf16
    # (keep preferred_element_type=f32) and loosen the reference tolerance.

    smem = pl.BlockSpec(memory_space=pltpu.MemorySpace.SMEM)
    vmem = pl.BlockSpec(memory_space=pltpu.MemorySpace.VMEM)
    in_specs = [smem] + [vmem] * (len(inputs) - 1)

    out_shape = jax.ShapeDtypeStruct((Bp, 3 * L), jnp.float32)   # [z | mu | log_sigma]

    scratch = [
        pltpu.VMEM((S * Bp, 4 * H), jnp.float32),   # gate precompute (per layer)
        pltpu.VMEM((S * Bp, H), jnp.float32),       # hidden sequence ping
        pltpu.VMEM((S * Bp, H), jnp.float32),       # hidden sequence pong
    ]

    # Explicit VMEM budget sized from the actual footprint (+ headroom).
    footprint = sum(int(a.size) * a.dtype.itemsize for a in inputs)
    footprint += math.prod(out_shape.shape) * 4
    footprint += (S * Bp * 4 * H + 2 * S * Bp * H) * 4
    vmem_limit = max(2 * footprint + (1 << 20), 4 << 20)

    kernel = functools.partial(encoder_fused_kernel, num_layers, H, L, Bp)
    out = pl.pallas_call(
        kernel,
        out_shape=out_shape,
        in_specs=in_specs,
        out_specs=vmem,
        scratch_shapes=scratch,
        compiler_params=pltpu.CompilerParams(vmem_limit_bytes=vmem_limit),
    )(*inputs)
    # TODO(synk): at realistic batch add a batch-tile grid axis with
    # dimension_semantics=("parallel",) so work shards across v7x's 2 TensorCores.
    z = out[:B, :L]
    mu = out[:B, L: 2 * L]
    ls = out[:B, 2 * L:]
    return z, mu, ls


# ----------------------------------------------------------------------------
# Pure-JAX reference (PyTorch gate order / raw weights) for correctness check.
# ----------------------------------------------------------------------------
def encoder_forward_ref(params, X, noise, eps):
    B = X.shape[0]
    emb = jnp.take(params["embed"], X, axis=0)          # (B, S, E)
    x = jnp.transpose(emb, (1, 0, 2))                   # (S, B, E)
    h_finals, c_finals = [], []
    for raw in params["lstm_raw"]:
        w_ih, w_hh = raw["w_ih"], raw["w_hh"]           # (4H, in), (4H, H)
        b = raw["b_ih"] + raw["b_hh"]
        Hd = w_hh.shape[1]
        h = jnp.zeros((B, Hd), jnp.float32)
        c = jnp.zeros((B, Hd), jnp.float32)
        hs = []
        for t in range(x.shape[0]):
            gates = x[t] @ w_ih.T + h @ w_hh.T + b      # PyTorch order i, f, g, o
            i = jax.nn.sigmoid(gates[:, 0:Hd])
            f = jax.nn.sigmoid(gates[:, Hd:2 * Hd])
            g = jnp.tanh(gates[:, 2 * Hd:3 * Hd])
            o = jax.nn.sigmoid(gates[:, 3 * Hd:4 * Hd])
            c = f * c + i * g
            h = o * jnp.tanh(c)
            hs.append(h)
        h_finals.append(h)
        c_finals.append(c)
        x = jnp.stack(hs, axis=0)
    h_n = jnp.stack(h_finals, axis=0)
    c_n = jnp.stack(c_finals, axis=0)
    Hcat = jnp.concatenate([h_n, c_n], axis=2)
    C = jnp.transpose(Hcat, (1, 0, 2)).reshape(B, -1)
    mu = _selu(C @ params["w_mu"].T + params["b_mu"])
    log_sigma = _selu(C @ params["w_sig"].T + params["b_sig"])
    sd = jnp.exp(0.5 * log_sigma)
    z = mu + (eps * noise) * sd
    return z, mu, log_sigma


# ----------------------------------------------------------------------------
# Deterministic parameter construction (matches the PyTorch __init__ shapes).
# ----------------------------------------------------------------------------
def make_params(key, vocab_size, word_embed_dim, hidden_size, num_layers,
                latent_size, pad_idx):
    keys = jax.random.split(key, 4 + 4 * num_layers)
    ki = iter(keys)

    embed = jax.random.uniform(next(ki), (vocab_size, word_embed_dim),
                               jnp.float32, -0.1, 0.1)
    embed = embed.at[pad_idx].set(0.0)  # padding_idx row is zero

    H = hidden_size
    # column permutation: PyTorch (i, f, g, o) -> kernel (i, f, o, g)
    perm = jnp.concatenate([jnp.arange(0, 2 * H),
                            jnp.arange(3 * H, 4 * H),
                            jnp.arange(2 * H, 3 * H)])

    lstm_raw, lstm_kernel = [], []
    k_lstm = 1.0 / jnp.sqrt(hidden_size)
    for layer in range(num_layers):
        in_dim = word_embed_dim if layer == 0 else hidden_size
        w_ih = jax.random.uniform(next(ki), (4 * H, in_dim), jnp.float32, -k_lstm, k_lstm)
        w_hh = jax.random.uniform(next(ki), (4 * H, H), jnp.float32, -k_lstm, k_lstm)
        b_ih = jax.random.uniform(next(ki), (4 * H,), jnp.float32, -k_lstm, k_lstm)
        b_hh = jax.random.uniform(next(ki), (4 * H,), jnp.float32, -k_lstm, k_lstm)
        lstm_raw.append(dict(w_ih=w_ih, w_hh=w_hh, b_ih=b_ih, b_hh=b_hh))
        lstm_kernel.append(dict(
            w_ih_t=w_ih.T[:, perm],                       # (in_dim, 4H), (i,f,o,g)
            w_hh_t=w_hh.T[:, perm],                       # (H, 4H)
            b=(b_ih + b_hh)[perm].reshape(1, -1),         # (1, 4H)
        ))

    mlp_in = hidden_size * num_layers * 2

    def xavier_linear(k, fan_in, fan_out):
        kw, kb = jax.random.split(k)
        std = jnp.sqrt(2.0 / (fan_in + fan_out))
        w = std * jax.random.normal(kw, (fan_out, fan_in), jnp.float32)
        kb_bound = 1.0 / jnp.sqrt(fan_in)
        b = jax.random.uniform(kb, (fan_out,), jnp.float32, -kb_bound, kb_bound)
        return w, b

    w_mu, b_mu = xavier_linear(next(ki), mlp_in, latent_size)
    w_sig, b_sig = xavier_linear(next(ki), mlp_in, latent_size)

    # fused head: one (M, 2L) weight, one (1, 2L) bias
    w_head_t = jnp.concatenate([w_mu.T, w_sig.T], axis=1)
    b_head = jnp.concatenate([b_mu, b_sig]).reshape(1, -1)

    return dict(embed=embed,
                lstm=lstm_kernel, lstm_raw=lstm_raw,
                w_head_t=w_head_t, b_head=b_head,
                w_mu=w_mu, b_mu=b_mu, w_sig=w_sig, b_sig=b_sig)


if __name__ == "__main__":
    # Small config consistent with the module's __init__ (H=32 -> 4H=128 lanes).
    B, S = 2, 8
    vocab_size = 20
    word_embed_dim = 32
    hidden_size = 32
    num_layers = 2
    latent_size = 8
    pad_idx = 0
    eps = 1.0

    key = jax.random.PRNGKey(0)
    k_param, k_tok, k_noise = jax.random.split(key, 3)

    params = make_params(k_param, vocab_size, word_embed_dim, hidden_size,
                         num_layers, latent_size, pad_idx)

    X = jax.random.randint(k_tok, (B, S), 0, vocab_size, dtype=jnp.int32)
    # Deterministic stand-in for torch.randn_like in reparam_trick.
    noise = jax.random.normal(k_noise, (B, latent_size), jnp.float32)

    z, mu, log_sigma = encoder_forward(params, X, noise, eps)
    jax.block_until_ready((z, mu, log_sigma))

    # Sanity check against a pure-JAX reference that uses the raw PyTorch-order
    # weights (independently validates gate reordering + split-K head fusion).
    z_r, mu_r, ls_r = encoder_forward_ref(params, X, noise, eps)
    assert jnp.allclose(z, z_r, atol=1e-5), "z mismatch"
    assert jnp.allclose(mu, mu_r, atol=1e-5), "mu mismatch"
    assert jnp.allclose(log_sigma, ls_r, atol=1e-5), "log_sigma mismatch"

    print("KERNEL_OK")
</pallas_src>

<mosaic_0001>
module attributes {stable_mosaic.version = 11 : i64} {
  func.func @encoder_fused_kernel(%arg0: memref<1xf32, #tpu.memory_space<smem>>, %arg1: memref<64x32xf32, #tpu.memory_space<vmem>>, %arg2: memref<32x128xf32, #tpu.memory_space<vmem>>, %arg3: memref<32x128xf32, #tpu.memory_space<vmem>>, %arg4: memref<1x128xf32, #tpu.memory_space<vmem>>, %arg5: memref<32x128xf32, #tpu.memory_space<vmem>>, %arg6: memref<32x128xf32, #tpu.memory_space<vmem>>, %arg7: memref<1x128xf32, #tpu.memory_space<vmem>>, %arg8: memref<128x16xf32, #tpu.memory_space<vmem>>, %arg9: memref<1x16xf32, #tpu.memory_space<vmem>>, %arg10: memref<8x8xf32, #tpu.memory_space<vmem>>, %arg11: memref<8x24xf32, #tpu.memory_space<vmem>>, %arg12: memref<64x128xf32, #tpu.memory_space<vmem>>, %arg13: memref<64x32xf32, #tpu.memory_space<vmem>>, %arg14: memref<64x32xf32, #tpu.memory_space<vmem>>) attributes {dimension_semantics = [], scalar_prefetch = 0 : i64, scratch_operands = 3 : i64, tpu.core_type = #tpu.core_type<tc>} {
    %cst = arith.constant 0.000000e+00 : f32
    %0 = vector.broadcast %cst : f32 to vector<8x16xf32>
    %c0 = arith.constant 0 : index
    %c0_0 = arith.constant 0 : index
    %1 = vector.load %arg1[%c0, %c0_0] : memref<64x32xf32, #tpu.memory_space<vmem>>, vector<64x32xf32>
    %c0_1 = arith.constant 0 : index
    %c0_2 = arith.constant 0 : index
    %2 = vector.load %arg2[%c0_1, %c0_2] : memref<32x128xf32, #tpu.memory_space<vmem>>, vector<32x128xf32>
    %cst_3 = arith.constant dense<0.000000e+00> : vector<64x128xf32>
    %3 = tpu.matmul %1, %2, %cst_3 {dimension_numbers = #tpu.dot_dimension_numbers<[1], [0], [0], [1], [0, 0, 1, 1], [], []>} : vector<64x32xf32>, vector<32x128xf32>, vector<64x128xf32> -> vector<64x128xf32>
    %c0_4 = arith.constant 0 : index
    %c0_5 = arith.constant 0 : index
    %4 = vector.load %arg4[%c0_4, %c0_5] : memref<1x128xf32, #tpu.memory_space<vmem>>, vector<1x128xf32>
    %5 = vector.broadcast %4 : vector<1x128xf32> to vector<64x128xf32>
    %6 = arith.addf %3, %5 : vector<64x128xf32>
    %c0_6 = arith.constant 0 : index
    %c0_7 = arith.constant 0 : index
    %7 = vector.load %arg12[%c0_6, %c0_7] : memref<64x128xf32, #tpu.memory_space<vmem>>, vector<64x128xf32>
    tpu.vector_store %arg12[%c0_6, %c0_7], %6 {strides = array<i32>} : memref<64x128xf32, #tpu.memory_space<vmem>>, vector<64x128xf32>,
    %cst_8 = arith.constant 0.000000e+00 : f32
    %8 = vector.broadcast %cst_8 : f32 to vector<8x32xf32>
    %cst_9 = arith.constant 0.000000e+00 : f32
    %9 = vector.broadcast %cst_9 : f32 to vector<8x32xf32>
    %c0_10 = arith.constant 0 : index
    %c0_11 = arith.constant 0 : index
    %10 = vector.load %arg3[%c0_10, %c0_11] : memref<32x128xf32, #tpu.memory_space<vmem>>, vector<32x128xf32>
    %c0_12 = arith.constant 0 : index
    %c0_13 = arith.constant 0 : index
    %11 = vector.load %arg12[%c0_12, %c0_13] : memref<64x128xf32, #tpu.memory_space<vmem>>, vector<8x128xf32>
    %cst_14 = arith.constant dense<0.000000e+00> : vector<8x128xf32>
    %12 = tpu.matmul %8, %10, %cst_14 {dimension_numbers = #tpu.dot_dimension_numbers<[1], [0], [0], [1], [0, 0, 1, 1], [], []>} : vector<8x32xf32>, vector<32x128xf32>, vector<8x128xf32> -> vector<8x128xf32>
    %13 = arith.addf %11, %12 : vector<8x128xf32>
    %14 = vector.extract_strided_slice %13 {offsets = [0, 0], sizes = [8, 96], strides = [1, 1]} : vector<8x128xf32> to vector<8x96xf32>
    %15 = arith.negf %14 : vector<8x96xf32>
    %16 = math.exp %15 : vector<8x96xf32>
    %cst_15 = arith.constant 1.000000e+00 : f32
    %17 = vector.broadcast %cst_15 : f32 to vector<8x96xf32>
    %18 = arith.addf %17, %16 : vector<8x96xf32>
    %19 = arith.divf %17, %18 : vector<8x96xf32>
    %20 = vector.extract_strided_slice %13 {offsets = [0, 96], sizes = [8, 32], strides = [1, 1]} : vector<8x128xf32> to vector<8x32xf32>
    %21 = math.tanh %20 : vector<8x32xf32>
    %22 = vector.extract_strided_slice %19 {offsets = [0, 0], sizes = [8, 32], strides = [1, 1]} : vector<8x96xf32> to vector<8x32xf32>
    %23 = vector.extract_strided_slice %19 {offsets = [0, 32], sizes = [8, 32], strides = [1, 1]} : vector<8x96xf32> to vector<8x32xf32>
    %24 = vector.extract_strided_slice %19 {offsets = [0, 64], sizes = [8, 32], strides = [1, 1]} : vector<8x96xf32> to vector<8x32xf32>
    %25 = arith.mulf %23, %9 : vector<8x32xf32>
    %26 = arith.mulf %22, %21 : vector<8x32xf32>
    %27 = arith.addf %25, %26 : vector<8x32xf32>
    %28 = math.tanh %27 : vector<8x32xf32>
    %29 = arith.mulf %24, %28 : vector<8x32xf32>
    %c0_16 = arith.constant 0 : index
    %c0_17 = arith.constant 0 : index
    %30 = vector.load %arg13[%c0_16, %c0_17] : memref<64x32xf32, #tpu.memory_space<vmem>>, vector<8x32xf32>
    tpu.vector_store %arg13[%c0_16, %c0_17], %29 {strides = array<i32>} : memref<64x32xf32, #tpu.memory_space<vmem>>, vector<8x32xf32>,
    %c8 = arith.constant 8 : index
    %c0_18 = arith.constant 0 : index
    %31 = vector.load %arg12[%c8, %c0_18] : memref<64x128xf32, #tpu.memory_space<vmem>>, vector<8x128xf32>
    %cst_19 = arith.constant dense<0.000000e+00> : vector<8x128xf32>
    %32 = tpu.matmul %29, %10, %cst_19 {dimension_numbers = #tpu.dot_dimension_numbers<[1], [0], [0], [1], [0, 0, 1, 1], [], []>} : vector<8x32xf32>, vector<32x128xf32>, vector<8x128xf32> -> vector<8x128xf32>
    %33 = arith.addf %31, %32 : vector<8x128xf32>
    %34 = vector.extract_strided_slice %33 {offsets = [0, 0], sizes = [8, 96], strides = [1, 1]} : vector<8x128xf32> to vector<8x96xf32>
    %35 = arith.negf %34 : vector<8x96xf32>
    %36 = math.exp %35 : vector<8x96xf32>
    %cst_20 = arith.constant 1.000000e+00 : f32
    %37 = vector.broadcast %cst_20 : f32 to vector<8x96xf32>
    %38 = arith.addf %37, %36 : vector<8x96xf32>
    %39 = arith.divf %37, %38 : vector<8x96xf32>
    %40 = vector.extract_strided_slice %33 {offsets = [0, 96], sizes = [8, 32], strides = [1, 1]} : vector<8x128xf32> to vector<8x32xf32>
    %41 = math.tanh %40 : vector<8x32xf32>
    %42 = vector.extract_strided_slice %39 {offsets = [0, 0], sizes = [8, 32], strides = [1, 1]} : vector<8x96xf32> to vector<8x32xf32>
    %43 = vector.extract_strided_slice %39 {offsets = [0, 32], sizes = [8, 32], strides = [1, 1]} : vector<8x96xf32> to vector<8x32xf32>
    %44 = vector.extract_strided_slice %39 {offsets = [0, 64], sizes = [8, 32], strides = [1, 1]} : vector<8x96xf32> to vector<8x32xf32>
    %45 = arith.mulf %43, %27 : vector<8x32xf32>
    %46 = arith.mulf %42, %41 : vector<8x32xf32>
    %47 = arith.addf %45, %46 : vector<8x32xf32>
    %48 = math.tanh %47 : vector<8x32xf32>
    %49 = arith.mulf %44, %48 : vector<8x32xf32>
    %c8_21 = arith.constant 8 : index
    %c0_22 = arith.constant 0 : index
    %50 = vector.load %arg13[%c8_21, %c0_22] : memref<64x32xf32, #tpu.memory_space<vmem>>, vector<8x32xf32>
    tpu.vector_store %arg13[%c8_21, %c0_22], %49 {strides = array<i32>} : memref<64x32xf32, #tpu.memory_space<vmem>>, vector<8x32xf32>,
    %c16 = arith.constant 16 : index
    %c0_23 = arith.constant 0 : index
    %51 = vector.load %arg12[%c16, %c0_23] : memref<64x128xf32, #tpu.memory_space<vmem>>, vector<8x128xf32>
    %cst_24 = arith.constant dense<0.000000e+00> : vector<8x128xf32>
    %52 = tpu.matmul %49, %10, %cst_24 {dimension_numbers = #tpu.dot_dimension_numbers<[1], [0], [0], [1], [0, 0, 1, 1], [], []>} : vector<8x32xf32>, vector<32x128xf32>, vector<8x128xf32> -> vector<8x128xf32>
    %53 = arith.addf %51, %52 : vector<8x128xf32>
    %54 = vector.extract_strided_slice %53 {offsets = [0, 0], sizes = [8, 96], strides = [1, 1]} : vector<8x128xf32> to vector<8x96xf32>
    %55 = arith.negf %54 : vector<8x96xf32>
    %56 = math.exp %55 : vector<8x96xf32>
    %cst_25 = arith.constant 1.000000e+00 : f32
    %57 = vector.broadcast %cst_25 : f32 to vector<8x96xf32>
    %58 = arith.addf %57, %56 : vector<8x96xf32>
    %59 = arith.divf %57, %58 : vector<8x96xf32>
    %60 = vector.extract_strided_slice %53 {offsets = [0, 96], sizes = [8, 32], strides = [1, 1]} : vector<8x128xf32> to vector<8x32xf32>
    %61 = math.tanh %60 : vector<8x32xf32>
    %62 = vector.extract_strided_slice %59 {offsets = [0, 0], sizes = [8, 32], strides = [1, 1]} : vector<8x96xf32> to vector<8x32xf32>
    %63 = vector.extract_strided_slice %59 {offsets = [0, 32], sizes = [8, 32], strides = [1, 1]} : vector<8x96xf32> to vector<8x32xf32>
    %64 = vector.extract_strided_slice %59 {offsets = [0, 64], sizes = [8, 32], strides = [1, 1]} : vector<8x96xf32> to vector<8x32xf32>
    %65 = arith.mulf %63, %47 : vector<8x32xf32>
    %66 = arith.mulf %62, %61 : vector<8x32xf32>
    %67 = arith.addf %65, %66 : vector<8x32xf32>
    %68 = math.tanh %67 : vector<8x32xf32>
    %69 = arith.mulf %64, %68 : vector<8x32xf32>
    %c16_26 = arith.constant 16 : index
    %c0_27 = arith.constant 0 : index
    %70 = vector.load %arg13[%c16_26, %c0_27] : memref<64x32xf32, #tpu.memory_space<vmem>>, vector<8x32xf32>
    tpu.vector_store %arg13[%c16_26, %c0_27], %69 {strides = array<i32>} : memref<64x32xf32, #tpu.memory_space<vmem>>, vector<8x32xf32>,
    %c24 = arith.constant 24 : index
    %c0_28 = arith.constant 0 : index
    %71 = vector.load %arg12[%c24, %c0_28] : memref<64x128xf32, #tpu.memory_space<vmem>>, vector<8x128xf32>
    %cst_29 = arith.constant dense<0.000000e+00> : vector<8x128xf32>
    %72 = tpu.matmul %69, %10, %cst_29 {dimension_numbers = #tpu.dot_dimension_numbers<[1], [0], [0], [1], [0, 0, 1, 1], [], []>} : vector<8x32xf32>, vector<32x128xf32>, vector<8x128xf32> -> vector<8x128xf32>
    %73 = arith.addf %71, %72 : vector<8x128xf32>
    %74 = vector.extract_strided_slice %73 {offsets = [0, 0], sizes = [8, 96], strides = [1, 1]} : vector<8x128xf32> to vector<8x96xf32>
    %75 = arith.negf %74 : vector<8x96xf32>
    %76 = math.exp %75 : vector<8x96xf32>
    %cst_30 = arith.constant 1.000000e+00 : f32
    %77 = vector.broadcast %cst_30 : f32 to vector<8x96xf32>
    %78 = arith.addf %77, %76 : vector<8x96xf32>
    %79 = arith.divf %77, %78 : vector<8x96xf32>
    %80 = vector.extract_strided_slice %73 {offsets = [0, 96], sizes = [8, 32], strides = [1, 1]} : vector<8x128xf32> to vector<8x32xf32>
    %81 = math.tanh %80 : vector<8x32xf32>
    %82 = vector.extract_strided_slice %79 {offsets = [0, 0], sizes = [8, 32], strides = [1, 1]} : vector<8x96xf32> to vector<8x32xf32>
    %83 = vector.extract_strided_slice %79 {offsets = [0, 32], sizes = [8, 32], strides = [1, 1]} : vector<8x96xf32> to vector<8x32xf32>
    %84 = vector.extract_strided_slice %79 {offsets = [0, 64], sizes = [8, 32], strides = [1, 1]} : vector<8x96xf32> to vector<8x32xf32>
    %85 = arith.mulf %83, %67 : vector<8x32xf32>
    %86 = arith.mulf %82, %81 : vector<8x32xf32>
    %87 = arith.addf %85, %86 : vector<8x32xf32>
    %88 = math.tanh %87 : vector<8x32xf32>
    %89 = arith.mulf %84, %88 : vector<8x32xf32>
    %c24_31 = arith.constant 24 : index
    %c0_32 = arith.constant 0 : index
    %90 = vector.load %arg13[%c24_31, %c0_32] : memref<64x32xf32, #tpu.memory_space<vmem>>, vector<8x32xf32>
    tpu.vector_store %arg13[%c24_31, %c0_32], %89 {strides = array<i32>} : memref<64x32xf32, #tpu.memory_space<vmem>>, vector<8x32xf32>,
    %c32 = arith.constant 32 : index
    %c0_33 = arith.constant 0 : index
    %91 = vector.load %arg12[%c32, %c0_33] : memref<64x128xf32, #tpu.memory_space<vmem>>, vector<8x128xf32>
    %cst_34 = arith.constant dense<0.000000e+00> : vector<8x128xf32>
    %92 = tpu.matmul %89, %10, %cst_34 {dimension_numbers = #tpu.dot_dimension_numbers<[1], [0], [0], [1], [0, 0, 1, 1], [], []>} : vector<8x32xf32>, vector<32x128xf32>, vector<8x128xf32> -> vector<8x128xf32>
    %93 = arith.addf %91, %92 : vector<8x128xf32>
    %94 = vector.extract_strided_slice %93 {offsets = [0, 0], sizes = [8, 96], strides = [1, 1]} : vector<8x128xf32> to vector<8x96xf32>
    %95 = arith.negf %94 : vector<8x96xf32>
    %96 = math.exp %95 : vector<8x96xf32>
    %cst_35 = arith.constant 1.000000e+00 : f32
    %97 = vector.broadcast %cst_35 : f32 to vector<8x96xf32>
    %98 = arith.addf %97, %96 : vector<8x96xf32>
    %99 = arith.divf %97, %98 : vector<8x96xf32>
    %100 = vector.extract_strided_slice %93 {offsets = [0, 96], sizes = [8, 32], strides = [1, 1]} : vector<8x128xf32> to vector<8x32xf32>
    %101 = math.tanh %100 : vector<8x32xf32>
    %102 = vector.extract_strided_slice %99 {offsets = [0, 0], sizes = [8, 32], strides = [1, 1]} : vector<8x96xf32> to vector<8x32xf32>
    %103 = vector.extract_strided_slice %99 {offsets = [0, 32], sizes = [8, 32], strides = [1, 1]} : vector<8x96xf32> to vector<8x32xf32>
    %104 = vector.extract_strided_slice %99 {offsets = [0, 64], sizes = [8, 32], strides = [1, 1]} : vector<8x96xf32> to vector<8x32xf32>
    %105 = arith.mulf %103, %87 : vector<8x32xf32>
    %106 = arith.mulf %102, %101 : vector<8x32xf32>
    %107 = arith.addf %105, %106 : vector<8x32xf32>
    %108 = math.tanh %107 : vector<8x32xf32>
    %109 = arith.mulf %104, %108 : vector<8x32xf32>
    %c32_36 = arith.constant 32 : index
    %c0_37 = arith.constant 0 : index
    %110 = vector.load %arg13[%c32_36, %c0_37] : memref<64x32xf32, #tpu.memory_space<vmem>>, vector<8x32xf32>
    tpu.vector_store %arg13[%c32_36, %c0_37], %109 {strides = array<i32>} : memref<64x32xf32, #tpu.memory_space<vmem>>, vector<8x32xf32>,
    %c40 = arith.constant 40 : index
    %c0_38 = arith.constant 0 : index
    %111 = vector.load %arg12[%c40, %c0_38] : memref<64x128xf32, #tpu.memory_space<vmem>>, vector<8x128xf32>
    %cst_39 = arith.constant dense<0.000000e+00> : vector<8x128xf32>
    %112 = tpu.matmul %109, %10, %cst_39 {dimension_numbers = #tpu.dot_dimension_numbers<[1], [0], [0], [1], [0, 0, 1, 1], [], []>} : vector<8x32xf32>, vector<32x128xf32>, vector<8x128xf32> -> vector<8x128xf32>
    %113 = arith.addf %111, %112 : vector<8x128xf32>
    %114 = vector.extract_strided_slice %113 {offsets = [0, 0], sizes = [8, 96], strides = [1, 1]} : vector<8x128xf32> to vector<8x96xf32>
    %115 = arith.negf %114 : vector<8x96xf32>
    %116 = math.exp %115 : vector<8x96xf32>
    %cst_40 = arith.constant 1.000000e+00 : f32
    %117 = vector.broadcast %cst_40 : f32 to vector<8x96xf32>
    %118 = arith.addf %117, %116 : vector<8x96xf32>
    %119 = arith.divf %117, %118 : vector<8x96xf32>
    %120 = vector.extract_strided_slice %113 {offsets = [0, 96], sizes = [8, 32], strides = [1, 1]} : vector<8x128xf32> to vector<8x32xf32>
    %121 = math.tanh %120 : vector<8x32xf32>
    %122 = vector.extract_strided_slice %119 {offsets = [0, 0], sizes = [8, 32], strides = [1, 1]} : vector<8x96xf32> to vector<8x32xf32>
    %123 = vector.extract_strided_slice %119 {offsets = [0, 32], sizes = [8, 32], strides = [1, 1]} : vector<8x96xf32> to vector<8x32xf32>
    %124 = vector.extract_strided_slice %119 {offsets = [0, 64], sizes = [8, 32], strides = [1, 1]} : vector<8x96xf32> to vector<8x32xf32>
    %125 = arith.mulf %123, %107 : vector<8x32xf32>
    %126 = arith.mulf %122, %121 : vector<8x32xf32>
    %127 = arith.addf %125, %126 : vector<8x32xf32>
    %128 = math.tanh %127 : vector<8x32xf32>
    %129 = arith.mulf %124, %128 : vector<8x32xf32>
    %c40_41 = arith.constant 40 : index
    %c0_42 = arith.constant 0 : index
    %130 = vector.load %arg13[%c40_41, %c0_42] : memref<64x32xf32, #tpu.memory_space<vmem>>, vector<8x32xf32>
    tpu.vector_store %arg13[%c40_41, %c0_42], %129 {strides = array<i32>} : memref<64x32xf32, #tpu.memory_space<vmem>>, vector<8x32xf32>,
    %c48 = arith.constant 48 : index
    %c0_43 = arith.constant 0 : index
    %131 = vector.load %arg12[%c48, %c0_43] : memref<64x128xf32, #tpu.memory_space<vmem>>, vector<8x128xf32>
    %cst_44 = arith.constant dense<0.000000e+00> : vector<8x128xf32>
    %132 = tpu.matmul %129, %10, %cst_44 {dimension_numbers = #tpu.dot_dimension_numbers<[1], [0], [0], [1], [0, 0, 1, 1], [], []>} : vector<8x32xf32>, vector<32x128xf32>, vector<8x128xf32> -> vector<8x128xf32>
    %133 = arith.addf %131, %132 : vector<8x128xf32>
    %134 = vector.extract_strided_slice %133 {offsets = [0, 0], sizes = [8, 96], strides = [1, 1]} : vector<8x128xf32> to vector<8x96xf32>
    %135 = arith.negf %134 : vector<8x96xf32>
    %136 = math.exp %135 : vector<8x96xf32>
    %cst_45 = arith.constant 1.000000e+00 : f32
    %137 = vector.broadcast %cst_45 : f32 to vector<8x96xf32>
    %138 = arith.addf %137, %136 : vector<8x96xf32>
    %139 = arith.divf %137, %138 : vector<8x96xf32>
    %140 = vector.extract_strided_slice %133 {offsets = [0, 96], sizes = [8, 32], strides = [1, 1]} : vector<8x128xf32> to vector<8x32xf32>
    %141 = math.tanh %140 : vector<8x32xf32>
    %142 = vector.extract_strided_slice %139 {offsets = [0, 0], sizes = [8, 32], strides = [1, 1]} : vector<8x96xf32> to vector<8x32xf32>
    %143 = vector.extract_strided_slice %139 {offsets = [0, 32], sizes = [8, 32], strides = [1, 1]} : vector<8x96xf32> to vector<8x32xf32>
    %144 = vector.extract_strided_slice %139 {offsets = [0, 64], sizes = [8, 32], strides = [1, 1]} : vector<8x96xf32> to vector<8x32xf32>
    %145 = arith.mulf %143, %127 : vector<8x32xf32>
    %146 = arith.mulf %142, %141 : vector<8x32xf32>
    %147 = arith.addf %145, %146 : vector<8x32xf32>
    %148 = math.tanh %147 : vector<8x32xf32>
    %149 = arith.mulf %144, %148 : vector<8x32xf32>
    %c48_46 = arith.constant 48 : index
    %c0_47 = arith.constant 0 : index
    %150 = vector.load %arg13[%c48_46, %c0_47] : memref<64x32xf32, #tpu.memory_space<vmem>>, vector<8x32xf32>
    tpu.vector_store %arg13[%c48_46, %c0_47], %149 {strides = array<i32>} : memref<64x32xf32, #tpu.memory_space<vmem>>, vector<8x32xf32>,
    %c56 = arith.constant 56 : index
    %c0_48 = arith.constant 0 : index
    %151 = vector.load %arg12[%c56, %c0_48] : memref<64x128xf32, #tpu.memory_space<vmem>>, vector<8x128xf32>
    %cst_49 = arith.constant dense<0.000000e+00> : vector<8x128xf32>
    %152 = tpu.matmul %149, %10, %cst_49 {dimension_numbers = #tpu.dot_dimension_numbers<[1], [0], [0], [1], [0, 0, 1, 1], [], []>} : vector<8x32xf32>, vector<32x128xf32>, vector<8x128xf32> -> vector<8x128xf32>
    %153 = arith.addf %151, %152 : vector<8x128xf32>
    %154 = vector.extract_strided_slice %153 {offsets = [0, 0], sizes = [8, 96], strides = [1, 1]} : vector<8x128xf32> to vector<8x96xf32>
    %155 = arith.negf %154 : vector<8x96xf32>
    %156 = math.exp %155 : vector<8x96xf32>
    %cst_50 = arith.constant 1.000000e+00 : f32
    %157 = vector.broadcast %cst_50 : f32 to vector<8x96xf32>
    %158 = arith.addf %157, %156 : vector<8x96xf32>
    %159 = arith.divf %157, %158 : vector<8x96xf32>
    %160 = vector.extract_strided_slice %153 {offsets = [0, 96], sizes = [8, 32], strides = [1, 1]} : vector<8x128xf32> to vector<8x32xf32>
    %161 = math.tanh %160 : vector<8x32xf32>
    %162 = vector.extract_strided_slice %159 {offsets = [0, 0], sizes = [8, 32], strides = [1, 1]} : vector<8x96xf32> to vector<8x32xf32>
    %163 = vector.extract_strided_slice %159 {offsets = [0, 32], sizes = [8, 32], strides = [1, 1]} : vector<8x96xf32> to vector<8x32xf32>
    %164 = vector.extract_strided_slice %159 {offsets = [0, 64], sizes = [8, 32], strides = [1, 1]} : vector<8x96xf32> to vector<8x32xf32>
    %165 = arith.mulf %163, %147 : vector<8x32xf32>
    %166 = arith.mulf %162, %161 : vector<8x32xf32>
    %167 = arith.addf %165, %166 : vector<8x32xf32>
    %168 = math.tanh %167 : vector<8x32xf32>
    %169 = arith.mulf %164, %168 : vector<8x32xf32>
    %c56_51 = arith.constant 56 : index
    %c0_52 = arith.constant 0 : index
    %170 = vector.load %arg13[%c56_51, %c0_52] : memref<64x32xf32, #tpu.memory_space<vmem>>, vector<8x32xf32>
    tpu.vector_store %arg13[%c56_51, %c0_52], %169 {strides = array<i32>} : memref<64x32xf32, #tpu.memory_space<vmem>>, vector<8x32xf32>,
    %c0_53 = arith.constant 0 : index
    %c0_54 = arith.constant 0 : index
    %171 = vector.load %arg8[%c0_53, %c0_54] : memref<128x16xf32, #tpu.memory_space<vmem>>, vector<32x16xf32>
    %cst_55 = arith.constant dense<0.000000e+00> : vector<8x16xf32>
    %172 = tpu.matmul %169, %171, %cst_55 {dimension_numbers = #tpu.dot_dimension_numbers<[1], [0], [0], [1], [0, 0, 1, 1], [], []>} : vector<8x32xf32>, vector<32x16xf32>, vector<8x16xf32> -> vector<8x16xf32>
    %173 = arith.addf %0, %172 : vector<8x16xf32>
    %c32_56 = arith.constant 32 : index
    %c0_57 = arith.constant 0 : index
    %174 = vector.load %arg8[%c32_56, %c0_57] : memref<128x16xf32, #tpu.memory_space<vmem>>, vector<32x16xf32>
    %cst_58 = arith.constant dense<0.000000e+00> : vector<8x16xf32>
    %175 = tpu.matmul %167, %174, %cst_58 {dimension_numbers = #tpu.dot_dimension_numbers<[1], [0], [0], [1], [0, 0, 1, 1], [], []>} : vector<8x32xf32>, vector<32x16xf32>, vector<8x16xf32> -> vector<8x16xf32>
    %176 = arith.addf %173, %175 : vector<8x16xf32>
    %c0_59 = arith.constant 0 : index
    %c0_60 = arith.constant 0 : index
    %177 = vector.load %arg13[%c0_59, %c0_60] : memref<64x32xf32, #tpu.memory_space<vmem>>, vector<64x32xf32>
    %c0_61 = arith.constant 0 : index
    %c0_62 = arith.constant 0 : index
    %178 = vector.load %arg5[%c0_61, %c0_62] : memref<32x128xf32, #tpu.memory_space<vmem>>, vector<32x128xf32>
    %cst_63 = arith.constant dense<0.000000e+00> : vector<64x128xf32>
    %179 = tpu.matmul %177, %178, %cst_63 {dimension_numbers = #tpu.dot_dimension_numbers<[1], [0], [0], [1], [0, 0, 1, 1], [], []>} : vector<64x32xf32>, vector<32x128xf32>, vector<64x128xf32> -> vector<64x128xf32>
    %c0_64 = arith.constant 0 : index
    %c0_65 = arith.constant 0 : index
    %180 = vector.load %arg7[%c0_64, %c0_65] : memref<1x128xf32, #tpu.memory_space<vmem>>, vector<1x128xf32>
    %181 = vector.broadcast %180 : vector<1x128xf32> to vector<64x128xf32>
    %182 = arith.addf %179, %181 : vector<64x128xf32>
    %c0_66 = arith.constant 0 : index
    %c0_67 = arith.constant 0 : index
    %183 = vector.load %arg12[%c0_66, %c0_67] : memref<64x128xf32, #tpu.memory_space<vmem>>, vector<64x128xf32>
    tpu.vector_store %arg12[%c0_66, %c0_67], %182 {strides = array<i32>} : memref<64x128xf32, #tpu.memory_space<vmem>>, vector<64x128xf32>,
    %cst_68 = arith.constant 0.000000e+00 : f32
    %184 = vector.broadcast %cst_68 : f32 to vector<8x32xf32>
    %cst_69 = arith.constant 0.000000e+00 : f32
    %185 = vector.broadcast %cst_69 : f32 to vector<8x32xf32>
    %c0_70 = arith.constant 0 : index
    %c0_71 = arith.constant 0 : index
    %186 = vector.load %arg6[%c0_70, %c0_71] : memref<32x128xf32, #tpu.memory_space<vmem>>, vector<32x128xf32>
    %c0_72 = arith.constant 0 : index
    %c0_73 = arith.constant 0 : index
    %187 = vector.load %arg12[%c0_72, %c0_73] : memref<64x128xf32, #tpu.memory_space<vmem>>, vector<8x128xf32>
    %cst_74 = arith.constant dense<0.000000e+00> : vector<8x128xf32>
    %188 = tpu.matmul %184, %186, %cst_74 {dimension_numbers = #tpu.dot_dimension_numbers<[1], [0], [0], [1], [0, 0, 1, 1], [], []>} : vector<8x32xf32>, vector<32x128xf32>, vector<8x128xf32> -> vector<8x128xf32>
    %189 = arith.addf %187, %188 : vector<8x128xf32>
    %190 = vector.extract_strided_slice %189 {offsets = [0, 0], sizes = [8, 96], strides = [1, 1]} : vector<8x128xf32> to vector<8x96xf32>
    %191 = arith.negf %190 : vector<8x96xf32>
    %192 = math.exp %191 : vector<8x96xf32>
    %cst_75 = arith.constant 1.000000e+00 : f32
    %193 = vector.broadcast %cst_75 : f32 to vector<8x96xf32>
    %194 = arith.addf %193, %192 : vector<8x96xf32>
    %195 = arith.divf %193, %194 : vector<8x96xf32>
    %196 = vector.extract_strided_slice %189 {offsets = [0, 96], sizes = [8, 32], strides = [1, 1]} : vector<8x128xf32> to vector<8x32xf32>
    %197 = math.tanh %196 : vector<8x32xf32>
    %198 = vector.extract_strided_slice %195 {offsets = [0, 0], sizes = [8, 32], strides = [1, 1]} : vector<8x96xf32> to vector<8x32xf32>
    %199 = vector.extract_strided_slice %195 {offsets = [0, 32], sizes = [8, 32], strides = [1, 1]} : vector<8x96xf32> to vector<8x32xf32>
    %200 = vector.extract_strided_slice %195 {offsets = [0, 64], sizes = [8, 32], strides = [1, 1]} : vector<8x96xf32> to vector<8x32xf32>
    %201 = arith.mulf %199, %185 : vector<8x32xf32>
    %202 = arith.mulf %198, %197 : vector<8x32xf32>
    %203 = arith.addf %201, %202 : vector<8x32xf32>
    %204 = math.tanh %203 : vector<8x32xf32>
    %205 = arith.mulf %200, %204 : vector<8x32xf32>
    %c0_76 = arith.constant 0 : index
    %c0_77 = arith.constant 0 : index
    %206 = vector.load %arg14[%c0_76, %c0_77] : memref<64x32xf32, #tpu.memory_space<vmem>>, vector<8x32xf32>
    tpu.vector_store %arg14[%c0_76, %c0_77], %205 {strides = array<i32>} : memref<64x32xf32, #tpu.memory_space<vmem>>, vector<8x32xf32>,
    %c8_78 = arith.constant 8 : index
    %c0_79 = arith.constant 0 : index
    %207 = vector.load %arg12[%c8_78, %c0_79] : memref<64x128xf32, #tpu.memory_space<vmem>>, vector<8x128xf32>
    %cst_80 = arith.constant dense<0.000000e+00> : vector<8x128xf32>
    %208 = tpu.matmul %205, %186, %cst_80 {dimension_numbers = #tpu.dot_dimension_numbers<[1], [0], [0], [1], [0, 0, 1, 1], [], []>} : vector<8x32xf32>, vector<32x128xf32>, vector<8x128xf32> -> vector<8x128xf32>
    %209 = arith.addf %207, %208 : vector<8x128xf32>
    %210 = vector.extract_strided_slice %209 {offsets = [0, 0], sizes = [8, 96], strides = [1, 1]} : vector<8x128xf32> to vector<8x96xf32>
    %211 = arith.negf %210 : vector<8x96xf32>
    %212 = math.exp %211 : vector<8x96xf32>
    %cst_81 = arith.constant 1.000000e+00 : f32
    %213 = vector.broadcast %cst_81 : f32 to vector<8x96xf32>
    %214 = arith.addf %213, %212 : vector<8x96xf32>
    %215 = arith.divf %213, %214 : vector<8x96xf32>
    %216 = vector.extract_strided_slice %209 {offsets = [0, 96], sizes = [8, 32], strides = [1, 1]} : vector<8x128xf32> to vector<8x32xf32>
    %217 = math.tanh %216 : vector<8x32xf32>
    %218 = vector.extract_strided_slice %215 {offsets = [0, 0], sizes = [8, 32], strides = [1, 1]} : vector<8x96xf32> to vector<8x32xf32>
    %219 = vector.extract_strided_slice %215 {offsets = [0, 32], sizes = [8, 32], strides = [1, 1]} : vector<8x96xf32> to vector<8x32xf32>
    %220 = vector.extract_strided_slice %215 {offsets = [0, 64], sizes = [8, 32], strides = [1, 1]} : vector<8x96xf32> to vector<8x32xf32>
    %221 = arith.mulf %219, %203 : vector<8x32xf32>
    %222 = arith.mulf %218, %217 : vector<8x32xf32>
    %223 = arith.addf %221, %222 : vector<8x32xf32>
    %224 = math.tanh %223 : vector<8x32xf32>
    %225 = arith.mulf %220, %224 : vector<8x32xf32>
    %c8_82 = arith.constant 8 : index
    %c0_83 = arith.constant 0 : index
    %226 = vector.load %arg14[%c8_82, %c0_83] : memref<64x32xf32, #tpu.memory_space<vmem>>, vector<8x32xf32>
    tpu.vector_store %arg14[%c8_82, %c0_83], %225 {strides = array<i32>} : memref<64x32xf32, #tpu.memory_space<vmem>>, vector<8x32xf32>,
    %c16_84 = arith.constant 16 : index
    %c0_85 = arith.constant 0 : index
    %227 = vector.load %arg12[%c16_84, %c0_85] : memref<64x128xf32, #tpu.memory_space<vmem>>, vector<8x128xf32>
    %cst_86 = arith.constant dense<0.000000e+00> : vector<8x128xf32>
    %228 = tpu.matmul %225, %186, %cst_86 {dimension_numbers = #tpu.dot_dimension_numbers<[1], [0], [0], [1], [0, 0, 1, 1], [], []>} : vector<8x32xf32>, vector<32x128xf32>, vector<8x128xf32> -> vector<8x128xf32>
    %229 = arith.addf %227, %228 : vector<8x128xf32>
    %230 = vector.extract_strided_slice %229 {offsets = [0, 0], sizes = [8, 96], strides = [1, 1]} : vector<8x128xf32> to vector<8x96xf32>
    %231 = arith.negf %230 : vector<8x96xf32>
    %232 = math.exp %231 : vector<8x96xf32>
    %cst_87 = arith.constant 1.000000e+00 : f32
    %233 = vector.broadcast %cst_87 : f32 to vector<8x96xf32>
    %234 = arith.addf %233, %232 : vector<8x96xf32>
    %235 = arith.divf %233, %234 : vector<8x96xf32>
    %236 = vector.extract_strided_slice %229 {offsets = [0, 96], sizes = [8, 32], strides = [1, 1]} : vector<8x128xf32> to vector<8x32xf32>
    %237 = math.tanh %236 : vector<8x32xf32>
    %238 = vector.extract_strided_slice %235 {offsets = [0, 0], sizes = [8, 32], strides = [1, 1]} : vector<8x96xf32> to vector<8x32xf32>
    %239 = vector.extract_strided_slice %235 {offsets = [0, 32], sizes = [8, 32], strides = [1, 1]} : vector<8x96xf32> to vector<8x32xf32>
    %240 = vector.extract_strided_slice %235 {offsets = [0, 64], sizes = [8, 32], strides = [1, 1]} : vector<8x96xf32> to vector<8x32xf32>
    %241 = arith.mulf %239, %223 : vector<8x32xf32>
    %242 = arith.mulf %238, %237 : vector<8x32xf32>
    %243 = arith.addf %241, %242 : vector<8x32xf32>
    %244 = math.tanh %243 : vector<8x32xf32>
    %245 = arith.mulf %240, %244 : vector<8x32xf32>
    %c16_88 = arith.constant 16 : index
    %c0_89 = arith.constant 0 : index
    %246 = vector.load %arg14[%c16_88, %c0_89] : memref<64x32xf32, #tpu.memory_space<vmem>>, vector<8x32xf32>
    tpu.vector_store %arg14[%c16_88, %c0_89], %245 {strides = array<i32>} : memref<64x32xf32, #tpu.memory_space<vmem>>, vector<8x32xf32>,
    %c24_90 = arith.constant 24 : index
    %c0_91 = arith.constant 0 : index
    %247 = vector.load %arg12[%c24_90, %c0_91] : memref<64x128xf32, #tpu.memory_space<vmem>>, vector<8x128xf32>
    %cst_92 = arith.constant dense<0.000000e+00> : vector<8x128xf32>
    %248 = tpu.matmul %245, %186, %cst_92 {dimension_numbers = #tpu.dot_dimension_numbers<[1], [0], [0], [1], [0, 0, 1, 1], [], []>} : vector<8x32xf32>, vector<32x128xf32>, vector<8x128xf32> -> vector<8x128xf32>
    %249 = arith.addf %247, %248 : vector<8x128xf32>
    %250 = vector.extract_strided_slice %249 {offsets = [0, 0], sizes = [8, 96], strides = [1, 1]} : vector<8x128xf32> to vector<8x96xf32>
    %251 = arith.negf %250 : vector<8x96xf32>
    %252 = math.exp %251 : vector<8x96xf32>
    %cst_93 = arith.constant 1.000000e+00 : f32
    %253 = vector.broadcast %cst_93 : f32 to vector<8x96xf32>
    %254 = arith.addf %253, %252 : vector<8x96xf32>
    %255 = arith.divf %253, %254 : vector<8x96xf32>
    %256 = vector.extract_strided_slice %249 {offsets = [0, 96], sizes = [8, 32], strides = [1, 1]} : vector<8x128xf32> to vector<8x32xf32>
    %257 = math.tanh %256 : vector<8x32xf32>
    %258 = vector.extract_strided_slice %255 {offsets = [0, 0], sizes = [8, 32], strides = [1, 1]} : vector<8x96xf32> to vector<8x32xf32>
    %259 = vector.extract_strided_slice %255 {offsets = [0, 32], sizes = [8, 32], strides = [1, 1]} : vector<8x96xf32> to vector<8x32xf32>
    %260 = vector.extract_strided_slice %255 {offsets = [0, 64], sizes = [8, 32], strides = [1, 1]} : vector<8x96xf32> to vector<8x32xf32>
    %261 = arith.mulf %259, %243 : vector<8x32xf32>
    %262 = arith.mulf %258, %257 : vector<8x32xf32>
    %263 = arith.addf %261, %262 : vector<8x32xf32>
    %264 = math.tanh %263 : vector<8x32xf32>
    %265 = arith.mulf %260, %264 : vector<8x32xf32>
    %c24_94 = arith.constant 24 : index
    %c0_95 = arith.constant 0 : index
    %266 = vector.load %arg14[%c24_94, %c0_95] : memref<64x32xf32, #tpu.memory_space<vmem>>, vector<8x32xf32>
    tpu.vector_store %arg14[%c24_94, %c0_95], %265 {strides = array<i32>} : memref<64x32xf32, #tpu.memory_space<vmem>>, vector<8x32xf32>,
    %c32_96 = arith.constant 32 : index
    %c0_97 = arith.constant 0 : index
    %267 = vector.load %arg12[%c32_96, %c0_97] : memref<64x128xf32, #tpu.memory_space<vmem>>, vector<8x128xf32>
    %cst_98 = arith.constant dense<0.000000e+00> : vector<8x128xf32>
    %268 = tpu.matmul %265, %186, %cst_98 {dimension_numbers = #tpu.dot_dimension_numbers<[1], [0], [0], [1], [0, 0, 1, 1], [], []>} : vector<8x32xf32>, vector<32x128xf32>, vector<8x128xf32> -> vector<8x128xf32>
    %269 = arith.addf %267, %268 : vector<8x128xf32>
    %270 = vector.extract_strided_slice %269 {offsets = [0, 0], sizes = [8, 96], strides = [1, 1]} : vector<8x128xf32> to vector<8x96xf32>
    %271 = arith.negf %270 : vector<8x96xf32>
    %272 = math.exp %271 : vector<8x96xf32>
    %cst_99 = arith.constant 1.000000e+00 : f32
    %273 = vector.broadcast %cst_99 : f32 to vector<8x96xf32>
    %274 = arith.addf %273, %272 : vector<8x96xf32>
    %275 = arith.divf %273, %274 : vector<8x96xf32>
    %276 = vector.extract_strided_slice %269 {offsets = [0, 96], sizes = [8, 32], strides = [1, 1]} : vector<8x128xf32> to vector<8x32xf32>
    %277 = math.tanh %276 : vector<8x32xf32>
    %278 = vector.extract_strided_slice %275 {offsets = [0, 0], sizes = [8, 32], strides = [1, 1]} : vector<8x96xf32> to vector<8x32xf32>
    %279 = vector.extract_strided_slice %275 {offsets = [0, 32], sizes = [8, 32], strides = [1, 1]} : vector<8x96xf32> to vector<8x32xf32>
    %280 = vector.extract_strided_slice %275 {offsets = [0, 64], sizes = [8, 32], strides = [1, 1]} : vector<8x96xf32> to vector<8x32xf32>
    %281 = arith.mulf %279, %263 : vector<8x32xf32>
    %282 = arith.mulf %278, %277 : vector<8x32xf32>
    %283 = arith.addf %281, %282 : vector<8x32xf32>
    %284 = math.tanh %283 : vector<8x32xf32>
    %285 = arith.mulf %280, %284 : vector<8x32xf32>
    %c32_100 = arith.constant 32 : index
    %c0_101 = arith.constant 0 : index
    %286 = vector.load %arg14[%c32_100, %c0_101] : memref<64x32xf32, #tpu.memory_space<vmem>>, vector<8x32xf32>
    tpu.vector_store %arg14[%c32_100, %c0_101], %285 {strides = array<i32>} : memref<64x32xf32, #tpu.memory_space<vmem>>, vector<8x32xf32>,
    %c40_102 = arith.constant 40 : index
    %c0_103 = arith.constant 0 : index
    %287 = vector.load %arg12[%c40_102, %c0_103] : memref<64x128xf32, #tpu.memory_space<vmem>>, vector<8x128xf32>
    %cst_104 = arith.constant dense<0.000000e+00> : vector<8x128xf32>
    %288 = tpu.matmul %285, %186, %cst_104 {dimension_numbers = #tpu.dot_dimension_numbers<[1], [0], [0], [1], [0, 0, 1, 1], [], []>} : vector<8x32xf32>, vector<32x128xf32>, vector<8x128xf32> -> vector<8x128xf32>
    %289 = arith.addf %287, %288 : vector<8x128xf32>
    %290 = vector.extract_strided_slice %289 {offsets = [0, 0], sizes = [8, 96], strides = [1, 1]} : vector<8x128xf32> to vector<8x96xf32>
    %291 = arith.negf %290 : vector<8x96xf32>
    %292 = math.exp %291 : vector<8x96xf32>
    %cst_105 = arith.constant 1.000000e+00 : f32
    %293 = vector.broadcast %cst_105 : f32 to vector<8x96xf32>
    %294 = arith.addf %293, %292 : vector<8x96xf32>
    %295 = arith.divf %293, %294 : vector<8x96xf32>
    %296 = vector.extract_strided_slice %289 {offsets = [0, 96], sizes = [8, 32], strides = [1, 1]} : vector<8x128xf32> to vector<8x32xf32>
    %297 = math.tanh %296 : vector<8x32xf32>
    %298 = vector.extract_strided_slice %295 {offsets = [0, 0], sizes = [8, 32], strides = [1, 1]} : vector<8x96xf32> to vector<8x32xf32>
    %299 = vector.extract_strided_slice %295 {offsets = [0, 32], sizes = [8, 32], strides = [1, 1]} : vector<8x96xf32> to vector<8x32xf32>
    %300 = vector.extract_strided_slice %295 {offsets = [0, 64], sizes = [8, 32], strides = [1, 1]} : vector<8x96xf32> to vector<8x32xf32>
    %301 = arith.mulf %299, %283 : vector<8x32xf32>
    %302 = arith.mulf %298, %297 : vector<8x32xf32>
    %303 = arith.addf %301, %302 : vector<8x32xf32>
    %304 = math.tanh %303 : vector<8x32xf32>
    %305 = arith.mulf %300, %304 : vector<8x32xf32>
    %c40_106 = arith.constant 40 : index
    %c0_107 = arith.constant 0 : index
    %306 = vector.load %arg14[%c40_106, %c0_107] : memref<64x32xf32, #tpu.memory_space<vmem>>, vector<8x32xf32>
    tpu.vector_store %arg14[%c40_106, %c0_107], %305 {strides = array<i32>} : memref<64x32xf32, #tpu.memory_space<vmem>>, vector<8x32xf32>,
    %c48_108 = arith.constant 48 : index
    %c0_109 = arith.constant 0 : index
    %307 = vector.load %arg12[%c48_108, %c0_109] : memref<64x128xf32, #tpu.memory_space<vmem>>, vector<8x128xf32>
    %cst_110 = arith.constant dense<0.000000e+00> : vector<8x128xf32>
    %308 = tpu.matmul %305, %186, %cst_110 {dimension_numbers = #tpu.dot_dimension_numbers<[1], [0], [0], [1], [0, 0, 1, 1], [], []>} : vector<8x32xf32>, vector<32x128xf32>, vector<8x128xf32> -> vector<8x128xf32>
    %309 = arith.addf %307, %308 : vector<8x128xf32>
    %310 = vector.extract_strided_slice %309 {offsets = [0, 0], sizes = [8, 96], strides = [1, 1]} : vector<8x128xf32> to vector<8x96xf32>
    %311 = arith.negf %310 : vector<8x96xf32>
    %312 = math.exp %311 : vector<8x96xf32>
    %cst_111 = arith.constant 1.000000e+00 : f32
    %313 = vector.broadcast %cst_111 : f32 to vector<8x96xf32>
    %314 = arith.addf %313, %312 : vector<8x96xf32>
    %315 = arith.divf %313, %314 : vector<8x96xf32>
    %316 = vector.extract_strided_slice %309 {offsets = [0, 96], sizes = [8, 32], strides = [1, 1]} : vector<8x128xf32> to vector<8x32xf32>
    %317 = math.tanh %316 : vector<8x32xf32>
    %318 = vector.extract_strided_slice %315 {offsets = [0, 0], sizes = [8, 32], strides = [1, 1]} : vector<8x96xf32> to vector<8x32xf32>
    %319 = vector.extract_strided_slice %315 {offsets = [0, 32], sizes = [8, 32], strides = [1, 1]} : vector<8x96xf32> to vector<8x32xf32>
    %320 = vector.extract_strided_slice %315 {offsets = [0, 64], sizes = [8, 32], strides = [1, 1]} : vector<8x96xf32> to vector<8x32xf32>
    %321 = arith.mulf %319, %303 : vector<8x32xf32>
    %322 = arith.mulf %318, %317 : vector<8x32xf32>
    %323 = arith.addf %321, %322 : vector<8x32xf32>
    %324 = math.tanh %323 : vector<8x32xf32>
    %325 = arith.mulf %320, %324 : vector<8x32xf32>
    %c48_112 = arith.constant 48 : index
    %c0_113 = arith.constant 0 : index
    %326 = vector.load %arg14[%c48_112, %c0_113] : memref<64x32xf32, #tpu.memory_space<vmem>>, vector<8x32xf32>
    tpu.vector_store %arg14[%c48_112, %c0_113], %325 {strides = array<i32>} : memref<64x32xf32, #tpu.memory_space<vmem>>, vector<8x32xf32>,
    %c56_114 = arith.constant 56 : index
    %c0_115 = arith.constant 0 : index
    %327 = vector.load %arg12[%c56_114, %c0_115] : memref<64x128xf32, #tpu.memory_space<vmem>>, vector<8x128xf32>
    %cst_116 = arith.constant dense<0.000000e+00> : vector<8x128xf32>
    %328 = tpu.matmul %325, %186, %cst_116 {dimension_numbers = #tpu.dot_dimension_numbers<[1], [0], [0], [1], [0, 0, 1, 1], [], []>} : vector<8x32xf32>, vector<32x128xf32>, vector<8x128xf32> -> vector<8x128xf32>
    %329 = arith.addf %327, %328 : vector<8x128xf32>
    %330 = vector.extract_strided_slice %329 {offsets = [0, 0], sizes = [8, 96], strides = [1, 1]} : vector<8x128xf32> to vector<8x96xf32>
    %331 = arith.negf %330 : vector<8x96xf32>
    %332 = math.exp %331 : vector<8x96xf32>
    %cst_117 = arith.constant 1.000000e+00 : f32
    %333 = vector.broadcast %cst_117 : f32 to vector<8x96xf32>
    %334 = arith.addf %333, %332 : vector<8x96xf32>
    %335 = arith.divf %333, %334 : vector<8x96xf32>
    %336 = vector.extract_strided_slice %329 {offsets = [0, 96], sizes = [8, 32], strides = [1, 1]} : vector<8x128xf32> to vector<8x32xf32>
    %337 = math.tanh %336 : vector<8x32xf32>
    %338 = vector.extract_strided_slice %335 {offsets = [0, 0], sizes = [8, 32], strides = [1, 1]} : vector<8x96xf32> to vector<8x32xf32>
    %339 = vector.extract_strided_slice %335 {offsets = [0, 32], sizes = [8, 32], strides = [1, 1]} : vector<8x96xf32> to vector<8x32xf32>
    %340 = vector.extract_strided_slice %335 {offsets = [0, 64], sizes = [8, 32], strides = [1, 1]} : vector<8x96xf32> to vector<8x32xf32>
    %341 = arith.mulf %339, %323 : vector<8x32xf32>
    %342 = arith.mulf %338, %337 : vector<8x32xf32>
    %343 = arith.addf %341, %342 : vector<8x32xf32>
    %344 = math.tanh %343 : vector<8x32xf32>
    %345 = arith.mulf %340, %344 : vector<8x32xf32>
    %c56_118 = arith.constant 56 : index
    %c0_119 = arith.constant 0 : index
    %346 = vector.load %arg14[%c56_118, %c0_119] : memref<64x32xf32, #tpu.memory_space<vmem>>, vector<8x32xf32>
    tpu.vector_store %arg14[%c56_118, %c0_119], %345 {strides = array<i32>} : memref<64x32xf32, #tpu.memory_space<vmem>>, vector<8x32xf32>,
    %c64 = arith.constant 64 : index
    %c0_120 = arith.constant 0 : index
    %347 = vector.load %arg8[%c64, %c0_120] : memref<128x16xf32, #tpu.memory_space<vmem>>, vector<32x16xf32>
    %cst_121 = arith.constant dense<0.000000e+00> : vector<8x16xf32>
    %348 = tpu.matmul %345, %347, %cst_121 {dimension_numbers = #tpu.dot_dimension_numbers<[1], [0], [0], [1], [0, 0, 1, 1], [], []>} : vector<8x32xf32>, vector<32x16xf32>, vector<8x16xf32> -> vector<8x16xf32>
    %349 = arith.addf %176, %348 : vector<8x16xf32>
    %c96 = arith.constant 96 : index
    %c0_122 = arith.constant 0 : index
    %350 = vector.load %arg8[%c96, %c0_122] : memref<128x16xf32, #tpu.memory_space<vmem>>, vector<32x16xf32>
    %cst_123 = arith.constant dense<0.000000e+00> : vector<8x16xf32>
    %351 = tpu.matmul %343, %350, %cst_123 {dimension_numbers = #tpu.dot_dimension_numbers<[1], [0], [0], [1], [0, 0, 1, 1], [], []>} : vector<8x32xf32>, vector<32x16xf32>, vector<8x16xf32> -> vector<8x16xf32>
    %352 = arith.addf %349, %351 : vector<8x16xf32>
    %c0_124 = arith.constant 0 : index
    %c0_125 = arith.constant 0 : index
    %353 = vector.load %arg9[%c0_124, %c0_125] : memref<1x16xf32, #tpu.memory_space<vmem>>, vector<1x16xf32>
    %354 = vector.broadcast %353 : vector<1x16xf32> to vector<8x16xf32>
    %355 = arith.addf %352, %354 : vector<8x16xf32>
    %356 = vector.extract_strided_slice %355 {offsets = [0, 0], sizes = [8, 8], strides = [1, 1]} : vector<8x16xf32> to vector<8x8xf32>
    %cst_126 = arith.constant 0.000000e+00 : f32
    %357 = vector.broadcast %cst_126 : f32 to vector<8x8xf32>
    %358 = arith.cmpf ogt, %356, %357 : vector<8x8xf32>
    %cst_127 = arith.constant 0.000000e+00 : f32
    %359 = vector.broadcast %cst_127 : f32 to vector<8x8xf32>
    %360 = arith.minimumf %356, %359 : vector<8x8xf32>
    %361 = math.exp %360 : vector<8x8xf32>
    %cst_128 = arith.constant 1.000000e+00 : f32
    %362 = vector.broadcast %cst_128 : f32 to vector<8x8xf32>
    %363 = arith.subf %361, %362 : vector<8x8xf32>
    %cst_129 = arith.constant 1.67326319 : f32
    %364 = vector.broadcast %cst_129 : f32 to vector<8x8xf32>
    %365 = arith.mulf %364, %363 : vector<8x8xf32>
    %366 = arith.select %358, %356, %365 : vector<8x8xi1>, vector<8x8xf32>
    %cst_130 = arith.constant 1.05070102 : f32
    %367 = vector.broadcast %cst_130 : f32 to vector<8x8xf32>
    %368 = arith.mulf %367, %366 : vector<8x8xf32>
    %369 = vector.extract_strided_slice %355 {offsets = [0, 8], sizes = [8, 8], strides = [1, 1]} : vector<8x16xf32> to vector<8x8xf32>
    %cst_131 = arith.constant 0.000000e+00 : f32
    %370 = vector.broadcast %cst_131 : f32 to vector<8x8xf32>
    %371 = arith.cmpf ogt, %369, %370 : vector<8x8xf32>
    %cst_132 = arith.constant 0.000000e+00 : f32
    %372 = vector.broadcast %cst_132 : f32 to vector<8x8xf32>
    %373 = arith.minimumf %369, %372 : vector<8x8xf32>
    %374 = math.exp %373 : vector<8x8xf32>
    %cst_133 = arith.constant 1.000000e+00 : f32
    %375 = vector.broadcast %cst_133 : f32 to vector<8x8xf32>
    %376 = arith.subf %374, %375 : vector<8x8xf32>
    %cst_134 = arith.constant 1.67326319 : f32
    %377 = vector.broadcast %cst_134 : f32 to vector<8x8xf32>
    %378 = arith.mulf %377, %376 : vector<8x8xf32>
    %379 = arith.select %371, %369, %378 : vector<8x8xi1>, vector<8x8xf32>
    %cst_135 = arith.constant 1.05070102 : f32
    %380 = vector.broadcast %cst_135 : f32 to vector<8x8xf32>
    %381 = arith.mulf %380, %379 : vector<8x8xf32>
    %cst_136 = arith.constant 5.000000e-01 : f32
    %382 = vector.broadcast %cst_136 : f32 to vector<8x8xf32>
    %383 = arith.mulf %382, %381 : vector<8x8xf32>
    %384 = math.exp %383 : vector<8x8xf32>
    %c0_137 = arith.constant 0 : index
    %385 = memref.load %arg0[%c0_137] : memref<1xf32, #tpu.memory_space<smem>>
    %c0_138 = arith.constant 0 : index
    %c0_139 = arith.constant 0 : index
    %386 = vector.load %arg10[%c0_138, %c0_139] : memref<8x8xf32, #tpu.memory_space<vmem>>, vector<8x8xf32>
    %387 = vector.broadcast %385 : f32 to vector<8x8xf32>
    %388 = arith.mulf %387, %386 : vector<8x8xf32>
    %389 = arith.mulf %388, %384 : vector<8x8xf32>
    %390 = arith.addf %368, %389 : vector<8x8xf32>
    %391 = tpu.concatenate %390, %368, %381 in 1 : vector<8x8xf32>, vector<8x8xf32>, vector<8x8xf32> -> vector<8x24xf32>
    %c0_140 = arith.constant 0 : index
    %c0_141 = arith.constant 0 : index
    %392 = vector.load %arg11[%c0_140, %c0_141] : memref<8x24xf32, #tpu.memory_space<vmem>>, vector<8x24xf32>
    tpu.vector_store %arg11[%c0_140, %c0_141], %391 {strides = array<i32>} : memref<8x24xf32, #tpu.memory_space<vmem>>, vector<8x24xf32>,
    return
  }
}

</mosaic_0001>

<bundles_post_ra>
// kernel: tpu_custom_call.1
= control target key start
LH: loop header
LB: loop body
LE: loop exit
PB: predicated region body
PF: predicated region fallthrough
CT: control target
= control target key end

     0   :  { %v2973_v3 = vmov 0.0   ;;  %vm59_vm0 = vcmask 261120   ;;  %s3544_s0 = inlined_call_operand.<no memory space> [shape: f32[1], index: 0, kind: input, shape index: {}]   ;;  %s3545_s1 = inlined_call_operand.vmem [shape: f32[64,32], index: 1, kind: input, shape index: {}]   ;;  %s3546_s2 = inlined_call_operand.vmem [shape: f32[32,128], index: 2, kind: input, shape index: {}]   ;;  %s3547_s3 = inlined_call_operand.vmem [shape: f32[32,128], index: 3, kind: input, shape index: {}]   ;;  %s3548_s4 = inlined_call_operand.vmem [shape: f32[1,128], index: 4, kind: input, shape index: {}]   ;;  %s3549_s5 = inlined_call_operand.vmem [shape: f32[32,128], index: 5, kind: input, shape index: {}]   ;;  %s3550_s6 = inlined_call_operand.vmem [shape: f32[32,128], index: 6, kind: input, shape index: {}]   ;;  %s3551_s7 = inlined_call_operand.vmem [shape: f32[1,128], index: 7, kind: input, shape index: {}]   ;;  %s3552_s8 = inlined_call_operand.vmem [shape: f32[128,16], index: 8, kind: input, shape index: {}]   ;;  %s3553_s9 = inlined_call_operand.vmem [shape: f32[1,16], index: 9, kind: input, shape index: {}]   ;;  %s3554_s10 = inlined_call_operand.vmem [shape: f32[8,8], index: 10, kind: input, shape index: {}]   ;;  %s3555_s11 = inlined_call_operand.hbm [shape: f32[8,24], index: 11, kind: output, shape index: {}]  }
   0x1   :  { %v51_v0 = vld [vmem:[%s3546_s2 + $0x18] sm:$0xff]  ;;  %v50_v1 = vld [vmem:[%s3546_s2 + $0x10] sm:$0xff]  ;;  %2571 = vmatprep.subr.mxu1 %v2973_v3  ;;  %v49_v5 = vld [vmem:[%s3546_s2 + $0x8] sm:$0xff] }
   0x2   :  { %v3050_v2 = vld [vmem:[%s3547_s3 + $0x18] sm:$0xff]  ;;  %2551 = vmatprep.subr.mxu0 %v51_v0  ;;  %v3056_v4 = vld [vmem:[%s3547_s3 + $0x10] sm:$0xff]  ;;  %v40_v6 = vld [vmem:[%s3545_s1] sm:$0xff] }
   0x3   :  { %2552 = vmatpush3.msra.mxu0 %v51_v0  ;;  %2572 = vmatpush3.msra.mxu1 %v3050_v2 }
   0x4   :  { %2553 = vmatprep.subr.mxu0 %v50_v1  ;;  %2573 = vmatprep.subr.mxu1 %v2973_v3 }
   0x5   :  { %17 = vsyncpa [#allocation7], 0  ;;  %2554 = vmatpush3.msra.mxu0 %v50_v1  ;;  %2574 = vmatpush3.msra.mxu1 %v3056_v4  ;;  %v48_v7 = vld [vmem:[%s3546_s2] sm:$0xff]  ;;  %v3073_v8 = vld [vmem:[%s3547_s3 + $0x8] sm:$0xff]  ;;  %vm2974_vm1 = vmmov 0   ;;  %s2975_s18 = smov 32  }
   0x6   :  { %2555 = vmatprep.subr.mxu0 %v49_v5  ;;  %2575 = vmatprep.subr.mxu1 %v2973_v3  ;;  %v41_v9 = vld [vmem:[%s3545_s1 + $0x8] sm:$0xff]  ;;  %v3083_v10 = vld [vmem:[%s3547_s3] sm:$0xff]  ;;  %v42_v46 = vld [vmem:[%s3545_s1 + $0x10] sm:$0xff]  ;;  %s2977_s20 = smov 96   ;;  %vm2353_vm3 = vcmask 64512   ;;  %s2980_s19 = smov [#allocation6]  }
   0x7   :  { %2556 = vmatpush3.msra.mxu0 %v49_v5  ;;  %2559 = vmatprep.mubr.msk.f32.mxu0 %vm59_vm0, %v40_v6  ;;  %v3115_v12 = vld [vmem:[%s3548_s4] ss:$0 sm:$0xff]  ;;  %s2976_s4 = smov 64   ;;  %v43_v47 = vld [vmem:[%s3545_s1 + $0x18] sm:$0xff]  ;;  %v45_v49 = vld [vmem:[%s3545_s1 + $0x28] sm:$0xff]  ;;  %s2365_s21 = sshll.u32 %s2980_s19, 4  ;;  %s2366_s21 = int_to_ptr.vmem [resolvable:$true] %s2365_s21 }
   0x8   :  { %2557 = vmatprep.subr.mxu0 %v48_v7  ;;  %2576 = vmatpush3.msra.mxu1 %v3073_v8  ;;  %v44_v48 = vld [vmem:[%s3545_s1 + $0x20] sm:$0xff]  ;;  %v46_v50 = vld [vmem:[%s3545_s1 + $0x30] sm:$0xff]  ;;  %v47_v51 = vld [vmem:[%s3545_s1 + $0x38] sm:$0xff]  ;;  %vm2355_vm4 = vcmask 130048   ;;  %vm2357_vm5 = vcmask 195584   ;;  %p2956_p1 = scmp.lt.s32.totalorder %s2366_s21, %s2366_s21 }
   0x9   :  { %2558 = vmatpush3.msra.mxu0 %v48_v7  ;;  %2577 = vmatprep.subr.mxu1 %v2973_v3 }
   0xa   :  { %2560 = vmatmul.mubr.msk.f32.vlgmr.msra.gmra.mxu0 %vm59_vm0, %v41_v9  ;;  %2578 = vmatpush3.msra.mxu1 %v3083_v10 }
   0xb   :  { %2579 = vmatprep.mubr.msk.f32.mxu1 %vm2974_vm1, %v2973_v3  ;;  %2582 = vmatprep.subr.mxu1 %v2973_v3 }
   0xc   :  { %2580 = vmatmul.mubr.f32.vlgmr.msra.gmra.mxu1 %v2973_v3  ;;  %2593 = vmatprep.subr.mxu0 %v2973_v3 }
   0xd   :  { %2583 = vmatpush3.msra.mxu1 %v3050_v2  ;;  %2590 = vmatprep.mubr.msk.f32.mxu1 %vm2974_vm1, %v2973_v3 }
   0xe   :  { %2584 = vmatprep.subr.mxu1 %v2973_v3  ;;  %2594 = vmatpush3.msra.mxu0 %v3050_v2 }
   0xf   :  { %2585 = vmatpush3.msra.mxu1 %v3056_v4  ;;  %2595 = vmatprep.subr.mxu0 %v2973_v3 }
  0x10   :  { %2586 = vmatprep.subr.mxu1 %v2973_v3  ;;  %2596 = vmatpush3.msra.mxu0 %v3056_v4 }
  0x11   :  { %2587 = vmatpush3.msra.mxu1 %v3073_v8  ;;  %2597 = vmatprep.subr.mxu0 %v2973_v3 }
  0x12   :  { %2588 = vmatprep.subr.mxu1 %v2973_v3  ;;  %2598 = vmatpush3.msra.mxu0 %v3073_v8 }
  0x13   :  { %2589 = vmatpush3.msra.mxu1 %v3083_v10  ;;  %2599 = vmatprep.subr.mxu0 %v2973_v3 }
  0x14   :  { %2600 = vmatpush3.msra.mxu0 %v3083_v10  ;;  %2604 = vmatprep.subr.mxu1 %v2973_v3 }
  0x15   :  { %2615 = vmatprep.subr.mxu0 %v2973_v3  ;;  %2562 = vmatprep.mubr.msk.f32.mxu0 %vm59_vm0, %v42_v46 }
  0x16   :  { %2563 = vmatmul.mubr.msk.f32.gmra.mxu0 %vm59_vm0, %v43_v47 }
  0x17   :  { %2565 = vmatprep.mubr.msk.f32.mxu0 %vm59_vm0, %v44_v48 }
  0x1a   :  { %2566 = vmatmul.mubr.msk.f32.gmra.mxu0 %vm59_vm0, %v45_v49 }
  0x1b   :  { %2568 = vmatprep.mubr.msk.f32.mxu0 %vm59_vm0, %v46_v50 }
  0x1e   :  { %2569 = vmatmul.mubr.msk.f32.gmra.mxu0 %vm59_vm0, %v47_v51 }
  0x1f   :  { %2601 = vmatprep.mubr.msk.f32.mxu0 %vm2974_vm1, %v2973_v3 }
  0xca   :  { %v2561_v11 = vpop.f32.mrf.mxu0 }
  0xcb   :  { %v156_v32 = vadd.f32 %v2561_v11, %v3115_v12 }
  0xcc   :  { %v150_v13 = vpop.f32.mrf.mxu0  ;;  %v271_v14 = vpop.f32.mrf.mxu1 }
  0xcd   :  { %v151_v15 = vadd.f32 %v3115_v12, %v150_v13 }
  0xce   :  { %v2581_v16 = vpop.f32.mrf.mxu1 }
  0xcf   :  { %v275_v17 = vadd.f32 %v271_v14, %v151_v15 }
  0xd1   :  { %2819 = vtanh.f32 %v275_v17  ;;  %v2382_v19 = vmul.f32 -1.442695, %v275_v17 }
  0xd3   :  { %2821 = vpow2.f32 %v2382_v19 }
  0xd6   :  { %v2564_v56 = vpop.f32.mrf.mxu0 }
  0xd8   :  { %v160_v57 = vpop.f32.mrf.mxu0 }
  0xd9   :  { %v161_v62 = vadd.f32 %v3115_v12, %v160_v57 }
  0xda   :  { %v3177_v58 = vpop.f32.mrf.mxu0 }
  0xdc   :  { %v3179_v59 = vpop.f32.mrf.mxu0 }
  0xde   :  { %v2820_v18 = vpop.eup %2819  ;;  %v3181_v60 = vpop.f32.mrf.mxu0 }
  0xdf   :  { %285 = vrot.lane.b32.xlu0 %v2820_v18, %s2975_s18 }
  0xe0   :  { %v2822_v20 = vpop.eup %2821  ;;  %v3183_v61 = vpop.f32.mrf.mxu0 }
  0xe1   :  { %v279_v21 = vadd.f32 1.0, %v2822_v20 }
  0xe3   :  { %2823 = vrcp.f32 %v279_v21 }
  0xf0   :  { %v2824_v22 = vpop.eup %2823 }
  0xf1   :  { %v283_v25 = vmul.f32 0.0, %v2824_v22 }
 0x151   :  { %v286_v23 = vpop.permute.xlu0 %285 }
 0x152   :  { %v288_v24 = vmul.f32 %v2824_v22, %v286_v23 }
 0x154   :  { %290 = vrot.lane.b32.xlu0 %v288_v24, %s2975_s18 }
 0x1c6   :  { %v291_v26 = vpop.permute.xlu0 %290 }
 0x1c7   :  { %v293_v27 = vadd.f32 %v291_v26, %v283_v25 }
 0x1c9   :  { %2825 = vtanh.f32 %v293_v27 }
 0x1d6   :  { %v2826_v28 = vpop.eup %2825 }
 0x1d7   :  { %296 = vrot.lane.b32.xlu1 %v2826_v28, %s2975_s18 }
 0x249   :  { %v297_v29 = vpop.permute.xlu1 %296 }
 0x24a   :  { %v299_v30 = vmul.f32 %v2824_v22, %v297_v29  ;;  %v166_v22 = vadd.f32 %v2564_v56, %v3115_v12 }
 0x24c   :  { %301 = vrot.lane.b32.xlu1 %v299_v30, %s2976_s4 }
 0x2be   :  { %v302_v31 = vpop.permute.xlu1 %301 }
 0x2bf   :  { %304 = vst.msk [vmem:[#allocation3] sm:$0xff] %vm59_vm0, %v302_v31  ;;  %2591 = vmatmul.mubr.msk.f32.vlgmr.msra.gmra.mxu1 %vm59_vm0, %v302_v31 }
 0x2c0   :  { %2605 = vmatpush3.msra.mxu1 %v3050_v2  ;;  %2612 = vmatprep.mubr.msk.f32.mxu1 %vm2974_vm1, %v2973_v3 }
 0x2c1   :  { %2606 = vmatprep.subr.mxu1 %v2973_v3 }
 0x2c2   :  { %2607 = vmatpush3.msra.mxu1 %v3056_v4 }
 0x2c3   :  { %2608 = vmatprep.subr.mxu1 %v2973_v3 }
 0x2c4   :  { %2609 = vmatpush3.msra.mxu1 %v3073_v8 }
 0x2c5   :  { %2610 = vmatprep.subr.mxu1 %v2973_v3 }
 0x2c6   :  { %2611 = vmatpush3.msra.mxu1 %v3083_v10 }
 0x2c7   :  { %2626 = vmatprep.subr.mxu1 %v2973_v3 }
 0x37f   :  { %v374_v33 = vpop.f32.mrf.mxu1 }
 0x380   :  { %v378_v34 = vadd.f32 %v374_v33, %v156_v32 }
 0x381   :  { %v2592_v35 = vpop.f32.mrf.mxu1 }
 0x382   :  { %2827 = vtanh.f32 %v378_v34  ;;  %v2384_v37 = vmul.f32 -1.442695, %v378_v34 }
 0x384   :  { %2829 = vpow2.f32 %v2384_v37 }
 0x38f   :  { %v2828_v36 = vpop.eup %2827 }
 0x390   :  { %388 = vrot.lane.b32.xlu0 %v2828_v36, %s2975_s18 }
 0x391   :  { %v2830_v38 = vpop.eup %2829 }
 0x392   :  { %v382_v39 = vadd.f32 1.0, %v2830_v38 }
 0x394   :  { %2831 = vrcp.f32 %v382_v39 }
 0x3a1   :  { %v2832_v40 = vpop.eup %2831 }
 0x3a2   :  { %v386_v43 = vmul.f32 %v2832_v40, %v293_v27 }
 0x402   :  { %v389_v41 = vpop.permute.xlu0 %388 }
 0x403   :  { %v391_v42 = vmul.f32 %v2832_v40, %v389_v41 }
 0x405   :  { %393 = vrot.lane.b32.xlu1 %v391_v42, %s2975_s18 }
 0x477   :  { %v394_v44 = vpop.permute.xlu1 %393 }
 0x478   :  { %v396_v45 = vadd.f32 %v394_v44, %v386_v43 }
 0x47a   :  { %2833 = vtanh.f32 %v396_v45 }
 0x487   :  { %v2834_v52 = vpop.eup %2833 }
 0x488   :  { %399 = vrot.lane.b32.xlu0 %v2834_v52, %s2975_s18 }
 0x4fa   :  { %v400_v53 = vpop.permute.xlu0 %399 }
 0x4fb   :  { %v402_v54 = vmul.f32 %v2832_v40, %v400_v53  ;;  %v171_v40 = vadd.f32 %v3115_v12, %v3179_v59 }
 0x4fd   :  { %404 = vrot.lane.b32.xlu1 %v402_v54, %s2976_s4 }
 0x56f   :  { %v405_v55 = vpop.permute.xlu1 %404 }
 0x570   :  { %407 = vst.msk [vmem:[#allocation3 + $0x8] sm:$0xff] %vm59_vm0, %v405_v55  ;;  %2602 = vmatmul.mubr.msk.f32.vlgmr.msra.gmra.mxu0 %vm59_vm0, %v405_v55 }
 0x571   :  { %2616 = vmatpush3.msra.mxu0 %v3050_v2  ;;  %2623 = vmatprep.mubr.msk.f32.mxu0 %vm2974_vm1, %v2973_v3 }
 0x572   :  { %2617 = vmatprep.subr.mxu0 %v2973_v3 }
 0x573   :  { %2618 = vmatpush3.msra.mxu0 %v3056_v4 }
 0x574   :  { %2619 = vmatprep.subr.mxu0 %v2973_v3 }
 0x575   :  { %2620 = vmatpush3.msra.mxu0 %v3073_v8 }
 0x576   :  { %2621 = vmatprep.subr.mxu0 %v2973_v3 }
 0x577   :  { %2622 = vmatpush3.msra.mxu0 %v3083_v10 }
 0x578   :  { %2637 = vmatprep.subr.mxu0 %v2973_v3 }
 0x630   :  { %v477_v63 = vpop.f32.mrf.mxu0 }
 0x631   :  { %v481_v0 = vadd.f32 %v477_v63, %v161_v62 }
 0x632   :  { %v2603_v1 = vpop.f32.mrf.mxu0 }
 0x633   :  { %2835 = vtanh.f32 %v481_v0  ;;  %v2386_v6 = vmul.f32 -1.442695, %v481_v0 }
 0x635   :  { %2837 = vpow2.f32 %v2386_v6 }
 0x640   :  { %v2836_v5 = vpop.eup %2835 }
 0x641   :  { %491 = vrot.lane.b32.xlu0 %v2836_v5, %s2975_s18 }
 0x642   :  { %v2838_v7 = vpop.eup %2837 }
 0x643   :  { %v485_v9 = vadd.f32 1.0, %v2838_v7 }
 0x645   :  { %2839 = vrcp.f32 %v485_v9 }
 0x652   :  { %v2840_v11 = vpop.eup %2839 }
 0x653   :  { %v489_v15 = vmul.f32 %v2840_v11, %v396_v45 }
 0x6b3   :  { %v492_v13 = vpop.permute.xlu0 %491 }
 0x6b4   :  { %v494_v14 = vmul.f32 %v2840_v11, %v492_v13 }
 0x6b6   :  { %496 = vrot.lane.b32.xlu1 %v494_v14, %s2975_s18 }
 0x728   :  { %v497_v16 = vpop.permute.xlu1 %496 }
 0x729   :  { %v499_v17 = vadd.f32 %v497_v16, %v489_v15  ;;  %v181_v16 = vadd.f32 %v3115_v12, %v3183_v61 }
 0x72b   :  { %2841 = vtanh.f32 %v499_v17 }
 0x738   :  { %v2842_v18 = vpop.eup %2841 }
 0x739   :  { %502 = vrot.lane.b32.xlu0 %v2842_v18, %s2975_s18 }
 0x7ab   :  { %v503_v19 = vpop.permute.xlu0 %502 }
 0x7ac   :  { %v505_v20 = vmul.f32 %v2840_v11, %v503_v19 }
 0x7ae   :  { %507 = vrot.lane.b32.xlu1 %v505_v20, %s2976_s4 }
 0x820   :  { %v508_v21 = vpop.permute.xlu1 %507 }
 0x821   :  { %510 = vst.msk [vmem:[#allocation3 + $0x10] sm:$0xff] %vm59_vm0, %v508_v21  ;;  %2613 = vmatmul.mubr.msk.f32.vlgmr.msra.gmra.mxu1 %vm59_vm0, %v508_v21 }
 0x822   :  { %2627 = vmatpush3.msra.mxu1 %v3050_v2  ;;  %2634 = vmatprep.mubr.msk.f32.mxu1 %vm2974_vm1, %v2973_v3 }
 0x823   :  { %2628 = vmatprep.subr.mxu1 %v2973_v3 }
 0x824   :  { %2629 = vmatpush3.msra.mxu1 %v3056_v4 }
 0x825   :  { %2630 = vmatprep.subr.mxu1 %v2973_v3 }
 0x826   :  { %2631 = vmatpush3.msra.mxu1 %v3073_v8 }
 0x827   :  { %2632 = vmatprep.subr.mxu1 %v2973_v3 }
 0x828   :  { %2633 = vmatpush3.msra.mxu1 %v3083_v10 }
 0x829   :  { %2648 = vmatprep.subr.mxu1 %v2973_v3 }
 0x8e1   :  { %v580_v23 = vpop.f32.mrf.mxu1 }
 0x8e2   :  { %v584_v24 = vadd.f32 %v580_v23, %v166_v22 }
 0x8e3   :  { %v2614_v25 = vpop.f32.mrf.mxu1 }
 0x8e4   :  { %2843 = vtanh.f32 %v584_v24  ;;  %v2388_v27 = vmul.f32 -1.442695, %v584_v24 }
 0x8e6   :  { %2845 = vpow2.f32 %v2388_v27 }
 0x8f1   :  { %v2844_v26 = vpop.eup %2843 }
 0x8f2   :  { %594 = vrot.lane.b32.xlu0 %v2844_v26, %s2975_s18 }
 0x8f3   :  { %v2846_v28 = vpop.eup %2845 }
 0x8f4   :  { %v588_v29 = vadd.f32 1.0, %v2846_v28 }
 0x8f6   :  { %2847 = vrcp.f32 %v588_v29 }
 0x903   :  { %v2848_v30 = vpop.eup %2847 }
 0x904   :  { %v592_v33 = vmul.f32 %v2848_v30, %v499_v17 }
 0x964   :  { %v595_v31 = vpop.permute.xlu0 %594 }
 0x965   :  { %v597_v32 = vmul.f32 %v2848_v30, %v595_v31 }
 0x967   :  { %599 = vrot.lane.b32.xlu1 %v597_v32, %s2975_s18 }
 0x9d9   :  { %v600_v34 = vpop.permute.xlu1 %599 }
 0x9da   :  { %v602_v35 = vadd.f32 %v600_v34, %v592_v33  ;;  %v186_v33 = vadd.f32 %v3181_v60, %v3115_v12  ;;  %v1032_v60 = vld [vmem:[%s3552_s8 + $0x30] sm:$0xff] }
 0x9dc   :  { %2849 = vtanh.f32 %v602_v35 }
 0x9e9   :  { %v2850_v36 = vpop.eup %2849 }
 0x9ea   :  { %605 = vrot.lane.b32.xlu0 %v2850_v36, %s2975_s18 }
 0xa5c   :  { %v606_v37 = vpop.permute.xlu0 %605 }
 0xa5d   :  { %v608_v38 = vmul.f32 %v2848_v30, %v606_v37 }
 0xa5f   :  { %610 = vrot.lane.b32.xlu1 %v608_v38, %s2976_s4 }
 0xad1   :  { %v611_v39 = vpop.permute.xlu1 %610 }
 0xad2   :  { %613 = vst.msk [vmem:[#allocation3 + $0x18] sm:$0xff] %vm59_vm0, %v611_v39  ;;  %2624 = vmatmul.mubr.msk.f32.vlgmr.msra.gmra.mxu0 %vm59_vm0, %v611_v39 }
 0xad3   :  { %2638 = vmatpush3.msra.mxu0 %v3050_v2  ;;  %2645 = vmatprep.mubr.msk.f32.mxu0 %vm2974_vm1, %v2973_v3 }
 0xad4   :  { %2639 = vmatprep.subr.mxu0 %v2973_v3 }
 0xad5   :  { %2640 = vmatpush3.msra.mxu0 %v3056_v4 }
 0xad6   :  { %2641 = vmatprep.subr.mxu0 %v2973_v3 }
 0xad7   :  { %2642 = vmatpush3.msra.mxu0 %v3073_v8 }
 0xad8   :  { %2643 = vmatprep.subr.mxu0 %v2973_v3 }
 0xad9   :  { %2644 = vmatpush3.msra.mxu0 %v3083_v10 }
 0xada   :  { %2659 = vmatprep.subr.mxu0 %v2973_v3 }
 0xb92   :  { %v683_v41 = vpop.f32.mrf.mxu0 }
 0xb93   :  { %v687_v42 = vadd.f32 %v683_v41, %v171_v40 }
 0xb94   :  { %v2625_v43 = vpop.f32.mrf.mxu0 }
 0xb95   :  { %2851 = vtanh.f32 %v687_v42  ;;  %v2390_v45 = vmul.f32 -1.442695, %v687_v42 }
 0xb97   :  { %2853 = vpow2.f32 %v2390_v45  ;;  %v1030_v45 = vld [vmem:[%s3552_s8 + $0x20] sm:$0xff] }
 0xba2   :  { %v2852_v44 = vpop.eup %2851 }
 0xba3   :  { %697 = vrot.lane.b32.xlu0 %v2852_v44, %s2975_s18  ;;  %v1031_v44 = vld [vmem:[%s3552_s8 + $0x28] sm:$0xff] }
 0xba4   :  { %v2854_v46 = vpop.eup %2853 }
 0xba5   :  { %v691_v47 = vadd.f32 1.0, %v2854_v46  ;;  %v1192_v46 = vld [vmem:[%s3549_s5 + $0x18] sm:$0xff] }
 0xba7   :  { %2855 = vrcp.f32 %v691_v47 }
 0xbb4   :  { %v2856_v48 = vpop.eup %2855 }
 0xbb5   :  { %v695_v51 = vmul.f32 %v2856_v48, %v602_v35 }
 0xc15   :  { %v698_v49 = vpop.permute.xlu0 %697 }
 0xc16   :  { %v700_v50 = vmul.f32 %v2856_v48, %v698_v49 }
 0xc18   :  { %702 = vrot.lane.b32.xlu1 %v700_v50, %s2975_s18  ;;  %v1029_v50 = vld [vmem:[%s3552_s8 + $0x18] sm:$0xff] }
 0xc8a   :  { %v703_v52 = vpop.permute.xlu1 %702 }
 0xc8b   :  { %v705_v53 = vadd.f32 %v703_v52, %v695_v51  ;;  %v1028_v51 = vld [vmem:[%s3552_s8 + $0x10] sm:$0xff]  ;;  %v1027_v52 = vld [vmem:[%s3552_s8 + $0x8] sm:$0xff] }
 0xc8d   :  { %2857 = vtanh.f32 %v705_v53 }
 0xc9a   :  { %v2858_v54 = vpop.eup %2857 }
 0xc9b   :  { %708 = vrot.lane.b32.xlu0 %v2858_v54, %s2975_s18 }
 0xd0d   :  { %v709_v55 = vpop.permute.xlu0 %708 }
 0xd0e   :  { %v711_v56 = vmul.f32 %v2856_v48, %v709_v55 }
 0xd10   :  { %713 = vrot.lane.b32.xlu1 %v711_v56, %s2976_s4  ;;  %v1191_v56 = vld [vmem:[%s3549_s5 + $0x10] sm:$0xff] }
 0xd82   :  { %v714_v57 = vpop.permute.xlu1 %713 }
 0xd83   :  { %716 = vst.msk [vmem:[#allocation3 + $0x20] sm:$0xff] %vm59_vm0, %v714_v57  ;;  %2635 = vmatmul.mubr.msk.f32.vlgmr.msra.gmra.mxu1 %vm59_vm0, %v714_v57  ;;  %v1181_v57 = vld [vmem:[#allocation3] sm:$0xff] }
 0xd84   :  { %2649 = vmatpush3.msra.mxu1 %v3050_v2  ;;  %2656 = vmatprep.mubr.msk.f32.mxu1 %vm2974_vm1, %v2973_v3  ;;  %v176_v2 = vadd.f32 %v3177_v58, %v3115_v12  ;;  %v1033_v12 = vld [vmem:[%s3552_s8 + $0x38] sm:$0xff] }
 0xd85   :  { %2650 = vmatprep.subr.mxu1 %v2973_v3 }
 0xd86   :  { %2651 = vmatpush3.msra.mxu1 %v3056_v4 }
 0xd87   :  { %2652 = vmatprep.subr.mxu1 %v2973_v3 }
 0xd88   :  { %2653 = vmatpush3.msra.mxu1 %v3073_v8 }
 0xd89   :  { %2654 = vmatprep.subr.mxu1 %v2973_v3 }
 0xd8a   :  { %2655 = vmatpush3.msra.mxu1 %v3083_v10 }
 0xd8b   :  { %2670 = vmatprep.subr.mxu1 %v2973_v3 }
 0xe43   :  { %v786_v59 = vpop.f32.mrf.mxu1 }
 0xe44   :  { %v790_v62 = vadd.f32 %v786_v59, %v176_v2  ;;  %v1190_v2 = vld [vmem:[%s3549_s5 + $0x8] sm:$0xff]  ;;  %v1189_v59 = vld [vmem:[%s3549_s5] sm:$0xff] }
 0xe45   :  { %v2636_v63 = vpop.f32.mrf.mxu1 }
 0xe46   :  { %2859 = vtanh.f32 %v790_v62  ;;  %v2392_v4 = vmul.f32 -1.442695, %v790_v62  ;;  %v1182_v62 = vld [vmem:[#allocation3 + $0x8] sm:$0xff]  ;;  %v1183_v63 = vld [vmem:[#allocation3 + $0x10] sm:$0xff] }
 0xe48   :  { %2861 = vpow2.f32 %v2392_v4  ;;  %v3324_v4 = vld [vmem:[%s3550_s6 + $0x10] sm:$0xff] }
 0xe53   :  { %v2860_v0 = vpop.eup %2859 }
 0xe54   :  { %800 = vrot.lane.b32.xlu0 %v2860_v0, %s2975_s18  ;;  %v3316_v0 = vld [vmem:[%s3550_s6 + $0x18] sm:$0xff] }
 0xe55   :  { %v2862_v1 = vpop.eup %2861 }
 0xe56   :  { %v794_v8 = vadd.f32 1.0, %v2862_v1  ;;  %v1184_v1 = vld [vmem:[#allocation3 + $0x18] sm:$0xff] }
 0xe58   :  { %2863 = vrcp.f32 %v794_v8  ;;  %v1185_v8 = vld [vmem:[#allocation3 + $0x20] sm:$0xff] }
 0xe65   :  { %v2864_v5 = vpop.eup %2863 }
 0xe66   :  { %v798_v7 = vmul.f32 %v2864_v5, %v705_v53  ;;  %v1026_v53 = vld [vmem:[%s3552_s8] sm:$0xff] }
 0xec6   :  { %v801_v6 = vpop.permute.xlu0 %800 }
 0xec7   :  { %v803_v10 = vmul.f32 %v2864_v5, %v801_v6 }
 0xec9   :  { %805 = vrot.lane.b32.xlu1 %v803_v10, %s2975_s18 }
 0xf3b   :  { %v806_v9 = vpop.permute.xlu1 %805 }
 0xf3c   :  { %v808_v58 = vadd.f32 %v806_v9, %v798_v7  ;;  %v3341_v7 = vld [vmem:[%s3550_s6] sm:$0xff] }
 0xf3e   :  { %2865 = vtanh.f32 %v808_v58 }
 0xf4b   :  { %v2866_v11 = vpop.eup %2865 }
 0xf4c   :  { %811 = vrot.lane.b32.xlu0 %v2866_v11, %s2975_s18 }
 0xfbe   :  { %v812_v13 = vpop.permute.xlu0 %811 }
 0xfbf   :  { %v814_v14 = vmul.f32 %v2864_v5, %v812_v13  ;;  %v3332_v5 = vld [vmem:[%s3550_s6 + $0x8] sm:$0xff]  ;;  %s2951_s6 = scalar_lea.vmem %s2366_s21, 128 }
 0xfc0   :  { %p2952_p0 = scmp.ne.s32.totalorder %s2366_s21, %s2951_s6  ;;  %p2957_p2 = scmp.lt.s32.totalorder %s2951_s6, %s2951_s6 }
 0xfc1   :  { %816 = vrot.lane.b32.xlu1 %v814_v14, %s2976_s4 }
 0xfc2   :  { %p2958_p3 = por %p2957_p2, %p2956_p1 }
 0xfc4   :  { %p2959_p4 = pnand %p2958_p3, %p2952_p0 }
0x1033   :  { %v817_v15 = vpop.permute.xlu1 %816 }
0x1034   :  { %819 = vst.msk [vmem:[#allocation3 + $0x28] sm:$0xff] %vm59_vm0, %v817_v15  ;;  %2646 = vmatmul.mubr.msk.f32.vlgmr.msra.gmra.mxu0 %vm59_vm0, %v817_v15 }
0x1035   :  { %2667 = vmatprep.mubr.msk.f32.mxu0 %vm2974_vm1, %v2973_v3  ;;  %2660 = vmatpush3.msra.mxu0 %v1033_v12 }
0x1036   :  { %2661 = vmatprep.subr.mxu0 %v2973_v3 }
0x1037   :  { %2662 = vmatpush3.msra.mxu0 %v1032_v60 }
0x1038   :  { %2663 = vmatprep.subr.mxu0 %v2973_v3 }
0x1039   :  { %2664 = vmatpush3.msra.mxu0 %v1031_v44 }
0x103a   :  { %2665 = vmatprep.subr.mxu0 %v2973_v3 }
0x103b   :  { %2666 = vmatpush3.msra.mxu0 %v1030_v45  ;;  %v1186_v9 = vld [vmem:[#allocation3 + $0x28] sm:$0xff] }
0x103c   :  { %2681 = vmatprep.subr.mxu0 %v1192_v46 }
0x10f4   :  { %v889_v17 = vpop.f32.mrf.mxu0 }
0x10f5   :  { %v893_v18 = vadd.f32 %v889_v17, %v181_v16 }
0x10f6   :  { %v2647_v19 = vpop.f32.mrf.mxu0 }
0x10f7   :  { %2867 = vtanh.f32 %v893_v18  ;;  %v2394_v21 = vmul.f32 -1.442695, %v893_v18 }
0x10f9   :  { %2869 = vpow2.f32 %v2394_v21 }
0x1104   :  { %v2868_v20 = vpop.eup %2867 }
0x1105   :  { %903 = vrot.lane.b32.xlu0 %v2868_v20, %s2975_s18  ;;  %v3382_v20 = vld [vmem:[%s3551_s7] ss:$0 sm:$0xff] }
0x1106   :  { %v2870_v22 = vpop.eup %2869 }
0x1107   :  { %v897_v23 = vadd.f32 1.0, %v2870_v22 }
0x1109   :  { %2871 = vrcp.f32 %v897_v23 }
0x1116   :  { %v2872_v24 = vpop.eup %2871 }
0x1117   :  { %v901_v27 = vmul.f32 %v2872_v24, %v808_v58 }
0x1177   :  { %v904_v25 = vpop.permute.xlu0 %903 }
0x1178   :  { %v906_v26 = vmul.f32 %v2872_v24, %v904_v25 }
0x117a   :  { %908 = vrot.lane.b32.xlu1 %v906_v26, %s2975_s18 }
0x11ec   :  { %v909_v28 = vpop.permute.xlu1 %908 }
0x11ed   :  { %v911_v61 = vadd.f32 %v909_v28, %v901_v27 }
0x11ef   :  { %2873 = vtanh.f32 %v911_v61 }
0x11fc   :  { %v2874_v29 = vpop.eup %2873 }
0x11fd   :  { %914 = vrot.lane.b32.xlu0 %v2874_v29, %s2975_s18 }
0x126f   :  { %v915_v30 = vpop.permute.xlu0 %914 }
0x1270   :  { %v917_v31 = vmul.f32 %v2872_v24, %v915_v30 }
0x1272   :  { %919 = vrot.lane.b32.xlu1 %v917_v31, %s2976_s4 }
0x12e4   :  { %v920_v32 = vpop.permute.xlu1 %919 }
0x12e5   :  { %922 = vst.msk [vmem:[#allocation3 + $0x30] sm:$0xff] %vm59_vm0, %v920_v32  ;;  %2657 = vmatmul.mubr.msk.f32.vlgmr.msra.gmra.mxu1 %vm59_vm0, %v920_v32 }
0x12e6   :  { %2678 = vmatprep.mubr.msk.f32.mxu1 %vm2974_vm1, %v2973_v3  ;;  %2671 = vmatpush3.msra.mxu1 %v1029_v50 }
0x12e7   :  { %2672 = vmatprep.subr.mxu1 %v2973_v3 }
0x12e8   :  { %2673 = vmatpush3.msra.mxu1 %v1028_v51 }
0x12e9   :  { %2674 = vmatprep.subr.mxu1 %v2973_v3 }
0x12ea   :  { %2675 = vmatpush3.msra.mxu1 %v1027_v52 }
0x12eb   :  { %2676 = vmatprep.subr.mxu1 %v2973_v3 }
0x12ec   :  { %2677 = vmatpush3.msra.mxu1 %v1026_v53  ;;  %v1187_v58 = vld [vmem:[#allocation3 + $0x30] sm:$0xff] }
0x12ed   :  { %2701 = vmatprep.subr.mxu1 %v2973_v3 }
0x13a5   :  { %v992_v34 = vpop.f32.mrf.mxu1 }
0x13a6   :  { %v996_v35 = vadd.f32 %v992_v34, %v186_v33 }
0x13a7   :  { %v2658_v36 = vpop.f32.mrf.mxu1 }
0x13a8   :  { %2875 = vtanh.f32 %v996_v35  ;;  %v2396_v38 = vmul.f32 -1.442695, %v996_v35 }
0x13aa   :  { %2877 = vpow2.f32 %v2396_v38 }
0x13b5   :  { %v2876_v37 = vpop.eup %2875 }
0x13b6   :  { %1006 = vrot.lane.b32.xlu0 %v2876_v37, %s2975_s18 }
0x13b7   :  { %v2878_v39 = vpop.eup %2877 }
0x13b8   :  { %v1000_v40 = vadd.f32 1.0, %v2878_v39 }
0x13ba   :  { %2879 = vrcp.f32 %v1000_v40 }
0x13c7   :  { %v3260_v41 = vpop.eup %2879 }
0x13c8   :  { %v1004_v47 = vmul.f32 %v3260_v41, %v911_v61 }
0x1428   :  { %v1007_v42 = vpop.permute.xlu0 %1006 }
0x1429   :  { %v1009_v43 = vmul.f32 %v3260_v41, %v1007_v42 }
0x142b   :  { %1011 = vrot.lane.b32.xlu1 %v1009_v43, %s2975_s18 }
0x149d   :  { %v1012_v48 = vpop.permute.xlu1 %1011 }
0x149e   :  { %v1014_v49 = vadd.f32 %v1012_v48, %v1004_v47 }
0x14a0   :  { %2881 = vtanh.f32 %v1014_v49  ;;  %1035 = vrot.lane.b32.xlu1 %v1014_v49, %s2977_s20 }
0x14ad   :  { %v2882_v54 = vpop.eup %2881 }
0x14ae   :  { %1017 = vrot.lane.b32.xlu0 %v2882_v54, %s2975_s18 }
0x1512   :  { %v1036_v55 = vpop.permute.xlu1 %1035 }
0x1513   :  { %2668 = vmatmul.mubr.msk.f32.vlgmr.msra.gmra.mxu0 %vm59_vm0, %v1036_v55 }
0x1514   :  { %2682 = vmatpush3.msra.mxu0 %v1192_v46  ;;  %2689 = vmatprep.mubr.msk.f32.mxu0 %vm59_vm0, %v1181_v57 }
0x1515   :  { %2683 = vmatprep.subr.mxu0 %v1191_v56 }
0x1516   :  { %2684 = vmatpush3.msra.mxu0 %v1191_v56 }
0x1517   :  { %2685 = vmatprep.subr.mxu0 %v1190_v2 }
0x1518   :  { %2686 = vmatpush3.msra.mxu0 %v1190_v2 }
0x1519   :  { %2687 = vmatprep.subr.mxu0 %v1189_v59 }
0x151a   :  { %2688 = vmatpush3.msra.mxu0 %v1189_v59 }
0x151b   :  { %2690 = vmatmul.mubr.msk.f32.vlgmr.msra.gmra.mxu0 %vm59_vm0, %v1182_v62  ;;  %2723 = vmatprep.subr.mxu0 %v2973_v3 }
0x151c   :  { %2692 = vmatprep.mubr.msk.f32.mxu0 %vm59_vm0, %v1183_v63  ;;  %2724 = vmatpush3.msra.mxu0 %v3316_v0 }
0x151d   :  { %2725 = vmatprep.subr.mxu0 %v2973_v3 }
0x151e   :  { %2726 = vmatpush3.msra.mxu0 %v3324_v4 }
0x151f   :  { %2693 = vmatmul.mubr.msk.f32.gmra.mxu0 %vm59_vm0, %v1184_v1  ;;  %2727 = vmatprep.subr.mxu0 %v2973_v3 }
0x1520   :  { %2695 = vmatprep.mubr.msk.f32.mxu0 %vm59_vm0, %v1185_v8  ;;  %v1018_v6 = vpop.permute.xlu0 %1017  ;;  %2728 = vmatpush3.msra.mxu0 %v3332_v5 }
0x1521   :  { %v1020_v10 = vmul.f32 %v3260_v41, %v1018_v6  ;;  %2729 = vmatprep.subr.mxu0 %v2973_v3 }
0x1522   :  { %2730 = vmatpush3.msra.mxu0 %v3341_v7 }
0x1523   :  { %2696 = vmatmul.mubr.msk.f32.gmra.mxu0 %vm59_vm0, %v1186_v9  ;;  %1022 = vrot.lane.b32.xlu0 %v1020_v10, %s2976_s4 }
0x1524   :  { %2698 = vmatprep.mubr.msk.f32.mxu0 %vm59_vm0, %v1187_v58  ;;  %2745 = vmatprep.subr.mxu0 %v2973_v3 }
0x1595   :  { %v1023_v11 = vpop.permute.xlu0 %1022 }
0x1596   :  { %1025 = vst.msk [vmem:[#allocation3 + $0x38] sm:$0xff] %vm59_vm0, %v1023_v11  ;;  %2679 = vmatmul.mubr.msk.f32.vlgmr.msra.gmra.mxu1 %vm59_vm0, %v1023_v11 }
0x1597   :  { %2702 = vmatpush3.msra.mxu1 %v3316_v0  ;;  %2709 = vmatprep.mubr.msk.f32.mxu1 %vm2974_vm1, %v2973_v3 }
0x1598   :  { %2703 = vmatprep.subr.mxu1 %v2973_v3 }
0x1599   :  { %2704 = vmatpush3.msra.mxu1 %v3324_v4 }
0x159a   :  { %2705 = vmatprep.subr.mxu1 %v2973_v3 }
0x159b   :  { %2706 = vmatpush3.msra.mxu1 %v3332_v5 }
0x159c   :  { %2707 = vmatprep.subr.mxu1 %v2973_v3 }
0x159d   :  { %2708 = vmatpush3.msra.mxu1 %v3341_v7  ;;  %v1188_v13 = vld [vmem:[#allocation3 + $0x38] sm:$0xff] }
0x159e   :  { %2710 = vmatmul.mubr.f32.vlgmr.msra.gmra.mxu1 %v2973_v3  ;;  %2699 = vmatmul.mubr.msk.f32.gmra.mxu0 %vm59_vm0, %v1188_v13 }
0x159f   :  { %2712 = vmatprep.subr.mxu1 %v2973_v3  ;;  %2720 = vmatprep.mubr.msk.f32.mxu1 %vm2974_vm1, %v2973_v3 }
0x15a0   :  { %2713 = vmatpush3.msra.mxu1 %v3316_v0  ;;  %2731 = vmatprep.mubr.msk.f32.mxu0 %vm2974_vm1, %v2973_v3 }
0x15a1   :  { %2714 = vmatprep.subr.mxu1 %v2973_v3 }
0x15a2   :  { %2715 = vmatpush3.msra.mxu1 %v3324_v4 }
0x15a3   :  { %2716 = vmatprep.subr.mxu1 %v2973_v3 }
0x15a4   :  { %2717 = vmatpush3.msra.mxu1 %v3332_v5 }
0x15a5   :  { %2718 = vmatprep.subr.mxu1 %v2973_v3 }
0x15a6   :  { %2719 = vmatpush3.msra.mxu1 %v3341_v7 }
0x15a7   :  { %2734 = vmatprep.subr.mxu1 %v2973_v3 }
0x15d3   :  { %v3375_v14 = vpop.f32.mrf.mxu0 }
0x15d5   :  { %v2669_v15 = vpop.f32.mrf.mxu0 }
0x15db   :  { %v2691_v16 = vpop.f32.mrf.mxu0 }
0x15dc   :  { %v1296_v38 = vadd.f32 %v2691_v16, %v3382_v20 }
0x15dd   :  { %v1290_v19 = vpop.f32.mrf.mxu0 }
0x15de   :  { %v1291_v21 = vadd.f32 %v3382_v20, %v1290_v19 }
0x15df   :  { %v2694_v54 = vpop.f32.mrf.mxu0 }
0x15e1   :  { %v1300_v55 = vpop.f32.mrf.mxu0 }
0x15e2   :  { %v1301_v62 = vadd.f32 %v3382_v20, %v1300_v55 }
0x15e3   :  { %v3416_v56 = vpop.f32.mrf.mxu0 }
0x15e5   :  { %v3418_v57 = vpop.f32.mrf.mxu0 }
0x1656   :  { %v3377_v17 = vpop.f32.mrf.mxu1 }
0x1658   :  { %v2680_v18 = vpop.f32.mrf.mxu1 }
0x165e   :  { %v1408_v22 = vpop.f32.mrf.mxu1  ;;  %v3420_v2 = vpop.f32.mrf.mxu0 }
0x165f   :  { %v1412_v23 = vadd.f32 %v1408_v22, %v1291_v21 }
0x1660   :  { %v2711_v24 = vpop.f32.mrf.mxu1  ;;  %v3422_v59 = vpop.f32.mrf.mxu0 }
0x1661   :  { %2883 = vtanh.f32 %v1412_v23  ;;  %v2408_v26 = vmul.f32 -1.442695, %v1412_v23 }
0x1663   :  { %2885 = vpow2.f32 %v2408_v26 }
0x166e   :  { %v2884_v25 = vpop.eup %2883 }
0x166f   :  { %1422 = vrot.lane.b32.xlu1 %v2884_v25, %s2975_s18  ;;  %v1306_v25 = vadd.f32 %v2694_v54, %v3382_v20 }
0x1670   :  { %v2886_v27 = vpop.eup %2885 }
0x1671   :  { %v1416_v28 = vadd.f32 1.0, %v2886_v27 }
0x1673   :  { %2887 = vrcp.f32 %v1416_v28 }
0x1680   :  { %v2888_v61 = vpop.eup %2887 }
0x1681   :  { %v1420_v31 = vmul.f32 0.0, %v2888_v61 }
0x16e1   :  { %v1423_v29 = vpop.permute.xlu1 %1422 }
0x16e2   :  { %v1425_v30 = vmul.f32 %v2888_v61, %v1423_v29 }
0x16e4   :  { %1427 = vrot.lane.b32.xlu0 %v1425_v30, %s2975_s18 }
0x1756   :  { %v1428_v32 = vpop.permute.xlu0 %1427 }
0x1757   :  { %v1430_v33 = vadd.f32 %v1428_v32, %v1420_v31 }
0x1759   :  { %2889 = vtanh.f32 %v1430_v33 }
0x1766   :  { %v2890_v34 = vpop.eup %2889 }
0x1767   :  { %1433 = vrot.lane.b32.xlu1 %v2890_v34, %s2975_s18 }
0x17d9   :  { %v1434_v35 = vpop.permute.xlu1 %1433 }
0x17da   :  { %v1436_v36 = vmul.f32 %v2888_v61, %v1434_v35 }
0x17dc   :  { %1438 = vrot.lane.b32.xlu0 %v1436_v36, %s2976_s4 }
0x184e   :  { %v1439_v37 = vpop.permute.xlu0 %1438 }
0x184f   :  { %2721 = vmatmul.mubr.msk.f32.vlgmr.msra.gmra.mxu1 %vm59_vm0, %v1439_v37 }
0x1850   :  { %2735 = vmatpush3.msra.mxu1 %v3316_v0  ;;  %2742 = vmatprep.mubr.msk.f32.mxu1 %vm2974_vm1, %v2973_v3 }
0x1851   :  { %2736 = vmatprep.subr.mxu1 %v2973_v3 }
0x1852   :  { %2737 = vmatpush3.msra.mxu1 %v3324_v4 }
0x1853   :  { %2738 = vmatprep.subr.mxu1 %v2973_v3 }
0x1854   :  { %2739 = vmatpush3.msra.mxu1 %v3332_v5 }
0x1855   :  { %2740 = vmatprep.subr.mxu1 %v2973_v3 }
0x1856   :  { %2741 = vmatpush3.msra.mxu1 %v3341_v7 }
0x1857   :  { %2756 = vmatprep.subr.mxu1 %v2973_v3 }
0x190f   :  { %v1511_v39 = vpop.f32.mrf.mxu1 }
0x1910   :  { %v1515_v40 = vadd.f32 %v1511_v39, %v1296_v38 }
0x1911   :  { %v2722_v41 = vpop.f32.mrf.mxu1 }
0x1912   :  { %2891 = vtanh.f32 %v1515_v40  ;;  %v2410_v43 = vmul.f32 -1.442695, %v1515_v40 }
0x1914   :  { %2893 = vpow2.f32 %v2410_v43 }
0x191f   :  { %v2892_v42 = vpop.eup %2891 }
0x1920   :  { %1525 = vrot.lane.b32.xlu1 %v2892_v42, %s2975_s18  ;;  %v1311_v42 = vadd.f32 %v3382_v20, %v3418_v57 }
0x1921   :  { %v2894_v12 = vpop.eup %2893 }
0x1922   :  { %v1519_v60 = vadd.f32 1.0, %v2894_v12 }
0x1924   :  { %2895 = vrcp.f32 %v1519_v60 }
0x1931   :  { %v2896_v44 = vpop.eup %2895 }
0x1932   :  { %v1523_v47 = vmul.f32 %v2896_v44, %v1430_v33 }
0x1992   :  { %v1526_v45 = vpop.permute.xlu1 %1525 }
0x1993   :  { %v1528_v46 = vmul.f32 %v2896_v44, %v1526_v45 }
0x1995   :  { %1530 = vrot.lane.b32.xlu0 %v1528_v46, %s2975_s18 }
0x1a07   :  { %v1531_v48 = vpop.permute.xlu0 %1530 }
0x1a08   :  { %v1533_v49 = vadd.f32 %v1531_v48, %v1523_v47 }
0x1a0a   :  { %2897 = vtanh.f32 %v1533_v49 }
0x1a17   :  { %v2898_v50 = vpop.eup %2897 }
0x1a18   :  { %1536 = vrot.lane.b32.xlu1 %v2898_v50, %s2975_s18 }
0x1a8a   :  { %v1537_v51 = vpop.permute.xlu1 %1536 }
0x1a8b   :  { %v1539_v52 = vmul.f32 %v2896_v44, %v1537_v51 }
0x1a8d   :  { %1541 = vrot.lane.b32.xlu0 %v1539_v52, %s2976_s4 }
0x1aff   :  { %v1542_v53 = vpop.permute.xlu0 %1541 }
0x1b00   :  { %2732 = vmatmul.mubr.msk.f32.vlgmr.msra.gmra.mxu0 %vm59_vm0, %v1542_v53 }
0x1b01   :  { %2746 = vmatpush3.msra.mxu0 %v3316_v0  ;;  %2753 = vmatprep.mubr.msk.f32.mxu0 %vm2974_vm1, %v2973_v3 }
0x1b02   :  { %2747 = vmatprep.subr.mxu0 %v2973_v3 }
0x1b03   :  { %2748 = vmatpush3.msra.mxu0 %v3324_v4 }
0x1b04   :  { %2749 = vmatprep.subr.mxu0 %v2973_v3 }
0x1b05   :  { %2750 = vmatpush3.msra.mxu0 %v3332_v5 }
0x1b06   :  { %2751 = vmatprep.subr.mxu0 %v2973_v3 }
0x1b07   :  { %2752 = vmatpush3.msra.mxu0 %v3341_v7 }
0x1b08   :  { %2767 = vmatprep.subr.mxu0 %v2973_v3 }
0x1bc0   :  { %v1614_v63 = vpop.f32.mrf.mxu0 }
0x1bc1   :  { %v1618_v1 = vadd.f32 %v1614_v63, %v1301_v62 }
0x1bc2   :  { %v2733_v8 = vpop.f32.mrf.mxu0 }
0x1bc3   :  { %2899 = vtanh.f32 %v1618_v1  ;;  %v2412_v10 = vmul.f32 -1.442695, %v1618_v1 }
0x1bc5   :  { %2901 = vpow2.f32 %v2412_v10 }
0x1bd0   :  { %v2900_v6 = vpop.eup %2899 }
0x1bd1   :  { %1628 = vrot.lane.b32.xlu1 %v2900_v6, %s2975_s18 }
0x1bd2   :  { %v2902_v9 = vpop.eup %2901 }
0x1bd3   :  { %v1622_v58 = vadd.f32 1.0, %v2902_v9 }
0x1bd5   :  { %2903 = vrcp.f32 %v1622_v58 }
0x1be2   :  { %v2904_v11 = vpop.eup %2903 }
0x1be3   :  { %v1626_v16 = vmul.f32 %v2904_v11, %v1533_v49 }
0x1c43   :  { %v1629_v13 = vpop.permute.xlu1 %1628 }
0x1c44   :  { %v1631_v15 = vmul.f32 %v2904_v11, %v1629_v13 }
0x1c46   :  { %1633 = vrot.lane.b32.xlu0 %v1631_v15, %s2975_s18 }
0x1cb8   :  { %v1634_v18 = vpop.permute.xlu0 %1633 }
0x1cb9   :  { %v1636_v19 = vadd.f32 %v1634_v18, %v1626_v16 }
0x1cbb   :  { %2905 = vtanh.f32 %v1636_v19 }
0x1cc8   :  { %v2906_v21 = vpop.eup %2905 }
0x1cc9   :  { %1639 = vrot.lane.b32.xlu1 %v2906_v21, %s2975_s18  ;;  %v1321_v21 = vadd.f32 %v3382_v20, %v3422_v59 }
0x1d3b   :  { %v1640_v22 = vpop.permute.xlu1 %1639 }
0x1d3c   :  { %v1642_v23 = vmul.f32 %v2904_v11, %v1640_v22 }
0x1d3e   :  { %1644 = vrot.lane.b32.xlu0 %v1642_v23, %s2976_s4 }
0x1db0   :  { %v1645_v24 = vpop.permute.xlu0 %1644 }
0x1db1   :  { %2743 = vmatmul.mubr.msk.f32.vlgmr.msra.gmra.mxu1 %vm59_vm0, %v1645_v24 }
0x1db2   :  { %2757 = vmatpush3.msra.mxu1 %v3316_v0  ;;  %2764 = vmatprep.mubr.msk.f32.mxu1 %vm2974_vm1, %v2973_v3 }
0x1db3   :  { %2758 = vmatprep.subr.mxu1 %v2973_v3 }
0x1db4   :  { %2759 = vmatpush3.msra.mxu1 %v3324_v4 }
0x1db5   :  { %2760 = vmatprep.subr.mxu1 %v2973_v3 }
0x1db6   :  { %2761 = vmatpush3.msra.mxu1 %v3332_v5 }
0x1db7   :  { %2762 = vmatprep.subr.mxu1 %v2973_v3 }
0x1db8   :  { %2763 = vmatpush3.msra.mxu1 %v3341_v7 }
0x1db9   :  { %2778 = vmatprep.subr.mxu1 %v2973_v3 }
0x1e71   :  { %v1717_v26 = vpop.f32.mrf.mxu1 }
0x1e72   :  { %v1721_v27 = vadd.f32 %v1717_v26, %v1306_v25 }
0x1e73   :  { %v2744_v28 = vpop.f32.mrf.mxu1 }
0x1e74   :  { %2907 = vtanh.f32 %v1721_v27  ;;  %v2414_v29 = vmul.f32 -1.442695, %v1721_v27 }
0x1e76   :  { %2909 = vpow2.f32 %v2414_v29 }
0x1e81   :  { %v2908_v61 = vpop.eup %2907 }
0x1e82   :  { %1731 = vrot.lane.b32.xlu1 %v2908_v61, %s2975_s18 }
0x1e83   :  { %v2910_v30 = vpop.eup %2909 }
0x1e84   :  { %v1725_v31 = vadd.f32 1.0, %v2910_v30 }
0x1e86   :  { %2911 = vrcp.f32 %v1725_v31 }
0x1e93   :  { %v2912_v32 = vpop.eup %2911 }
0x1e94   :  { %v1729_v35 = vmul.f32 %v2912_v32, %v1636_v19 }
0x1ef4   :  { %v1732_v33 = vpop.permute.xlu1 %1731 }
0x1ef5   :  { %v1734_v34 = vmul.f32 %v2912_v32, %v1732_v33 }
0x1ef7   :  { %1736 = vrot.lane.b32.xlu0 %v1734_v34, %s2975_s18 }
0x1f69   :  { %v1737_v36 = vpop.permute.xlu0 %1736 }
0x1f6a   :  { %v1739_v37 = vadd.f32 %v1737_v36, %v1729_v35 }
0x1f6c   :  { %2913 = vtanh.f32 %v1739_v37 }
0x1f79   :  { %v2914_v38 = vpop.eup %2913 }
0x1f7a   :  { %1742 = vrot.lane.b32.xlu1 %v2914_v38, %s2975_s18 }
0x1fec   :  { %v1743_v39 = vpop.permute.xlu1 %1742 }
0x1fed   :  { %v1745_v40 = vmul.f32 %v2912_v32, %v1743_v39 }
0x1fef   :  { %1747 = vrot.lane.b32.xlu0 %v1745_v40, %s2976_s4 }
0x2061   :  { %v1748_v41 = vpop.permute.xlu0 %1747 }
0x2062   :  { %2754 = vmatmul.mubr.msk.f32.vlgmr.msra.gmra.mxu0 %vm59_vm0, %v1748_v41 }
0x2063   :  { %2768 = vmatpush3.msra.mxu0 %v3316_v0  ;;  %2775 = vmatprep.mubr.msk.f32.mxu0 %vm2974_vm1, %v2973_v3 }
0x2064   :  { %2769 = vmatprep.subr.mxu0 %v2973_v3 }
0x2065   :  { %2770 = vmatpush3.msra.mxu0 %v3324_v4 }
0x2066   :  { %2771 = vmatprep.subr.mxu0 %v2973_v3 }
0x2067   :  { %2772 = vmatpush3.msra.mxu0 %v3332_v5 }
0x2068   :  { %2773 = vmatprep.subr.mxu0 %v2973_v3 }
0x2069   :  { %2774 = vmatpush3.msra.mxu0 %v3341_v7 }
0x206a   :  { %2789 = vmatprep.subr.mxu0 %v2973_v3 }
0x2122   :  { %v1820_v43 = vpop.f32.mrf.mxu0 }
0x2123   :  { %v1824_v12 = vadd.f32 %v1820_v43, %v1311_v42 }
0x2124   :  { %v2755_v60 = vpop.f32.mrf.mxu0 }
0x2125   :  { %2915 = vtanh.f32 %v1824_v12  ;;  %v2416_v45 = vmul.f32 -1.442695, %v1824_v12 }
0x2127   :  { %2917 = vpow2.f32 %v2416_v45 }
0x2132   :  { %v2916_v44 = vpop.eup %2915 }
0x2133   :  { %1834 = vrot.lane.b32.xlu1 %v2916_v44, %s2975_s18 }
0x2134   :  { %v2918_v46 = vpop.eup %2917 }
0x2135   :  { %v1828_v47 = vadd.f32 1.0, %v2918_v46 }
0x2137   :  { %2919 = vrcp.f32 %v1828_v47 }
0x2144   :  { %v2920_v48 = vpop.eup %2919 }
0x2145   :  { %v1832_v51 = vmul.f32 %v2920_v48, %v1739_v37  ;;  %v1326_v37 = vadd.f32 %v3420_v2, %v3382_v20  ;;  %v2242_v2 = vld [vmem:[%s3552_s8 + $0x70] sm:$0xff] }
0x21a5   :  { %v1835_v49 = vpop.permute.xlu1 %1834 }
0x21a6   :  { %v1837_v50 = vmul.f32 %v2920_v48, %v1835_v49  ;;  %v2241_v49 = vld [vmem:[%s3552_s8 + $0x68] sm:$0xff] }
0x21a8   :  { %1839 = vrot.lane.b32.xlu0 %v1837_v50, %s2975_s18  ;;  %v2240_v50 = vld [vmem:[%s3552_s8 + $0x60] sm:$0xff] }
0x221a   :  { %v1840_v52 = vpop.permute.xlu0 %1839 }
0x221b   :  { %v1842_v53 = vadd.f32 %v1840_v52, %v1832_v51  ;;  %v2166_v51 = vld [vmem:[%s3552_s8 + $0x58] sm:$0xff]  ;;  %v2165_v52 = vld [vmem:[%s3552_s8 + $0x50] sm:$0xff] }
0x221d   :  { %2921 = vtanh.f32 %v1842_v53 }
0x222a   :  { %v2922_v54 = vpop.eup %2921 }
0x222b   :  { %1845 = vrot.lane.b32.xlu1 %v2922_v54, %s2975_s18  ;;  %v2163_v54 = vld [vmem:[%s3552_s8 + $0x40] sm:$0xff] }
0x229d   :  { %v1846_v55 = vpop.permute.xlu1 %1845 }
0x229e   :  { %v1848_v57 = vmul.f32 %v2920_v48, %v1846_v55 }
0x22a0   :  { %1850 = vrot.lane.b32.xlu0 %v1848_v57, %s2976_s4 }
0x2312   :  { %v1851_v62 = vpop.permute.xlu0 %1850 }
0x2313   :  { %2765 = vmatmul.mubr.msk.f32.vlgmr.msra.gmra.mxu1 %vm59_vm0, %v1851_v62 }
0x2314   :  { %2779 = vmatpush3.msra.mxu1 %v3316_v0  ;;  %2786 = vmatprep.mubr.msk.f32.mxu1 %vm2974_vm1, %v2973_v3  ;;  %v1316_v0 = vadd.f32 %v3416_v56, %v3382_v20  ;;  %v2243_v20 = vld [vmem:[%s3552_s8 + $0x78] sm:$0xff] }
0x2315   :  { %2780 = vmatprep.subr.mxu1 %v2973_v3 }
0x2316   :  { %2781 = vmatpush3.msra.mxu1 %v3324_v4 }
0x2317   :  { %2782 = vmatprep.subr.mxu1 %v2973_v3 }
0x2318   :  { %2783 = vmatpush3.msra.mxu1 %v3332_v5 }
0x2319   :  { %2784 = vmatprep.subr.mxu1 %v2973_v3 }
0x231a   :  { %2785 = vmatpush3.msra.mxu1 %v3341_v7 }
0x231b   :  { %2800 = vmatprep.subr.mxu1 %v2973_v3 }
0x23d3   :  { %v1923_v63 = vpop.f32.mrf.mxu1 }
0x23d4   :  { %v1927_v1 = vadd.f32 %v1923_v63, %v1316_v0 }
0x23d5   :  { %v2766_v8 = vpop.f32.mrf.mxu1 }
0x23d6   :  { %2923 = vtanh.f32 %v1927_v1  ;;  %v2418_v4 = vmul.f32 -1.442695, %v1927_v1 }
0x23d8   :  { %2925 = vpow2.f32 %v2418_v4 }
0x23e3   :  { %v2924_v6 = vpop.eup %2923 }
0x23e4   :  { %1937 = vrot.lane.b32.xlu1 %v2924_v6, %s2975_s18 }
0x23e5   :  { %v2926_v10 = vpop.eup %2925 }
0x23e6   :  { %v1931_v5 = vadd.f32 1.0, %v2926_v10  ;;  %v2425_v10 = vld [vmem:[%s3553_s9] ss:$0 sm:$0xff] }
0x23e8   :  { %2927 = vrcp.f32 %v1931_v5 }
0x23f5   :  { %v2928_v9 = vpop.eup %2927 }
0x23f6   :  { %v1935_v11 = vmul.f32 %v2928_v9, %v1842_v53  ;;  %v2164_v53 = vld [vmem:[%s3552_s8 + $0x48] sm:$0xff] }
0x2456   :  { %v1938_v58 = vpop.permute.xlu1 %1937 }
0x2457   :  { %v1940_v7 = vmul.f32 %v2928_v9, %v1938_v58 }
0x2459   :  { %1942 = vrot.lane.b32.xlu0 %v1940_v7, %s2975_s18 }
0x24cb   :  { %v1943_v13 = vpop.permute.xlu0 %1942 }
0x24cc   :  { %v1945_v56 = vadd.f32 %v1943_v13, %v1935_v11 }
0x24ce   :  { %2929 = vtanh.f32 %v1945_v56 }
0x24db   :  { %v2930_v15 = vpop.eup %2929 }
0x24dc   :  { %1948 = vrot.lane.b32.xlu1 %v2930_v15, %s2975_s18 }
0x254e   :  { %v1949_v16 = vpop.permute.xlu1 %1948 }
0x254f   :  { %v1951_v18 = vmul.f32 %v2928_v9, %v1949_v16 }
0x2551   :  { %1953 = vrot.lane.b32.xlu0 %v1951_v18, %s2976_s4 }
0x25c3   :  { %v1954_v19 = vpop.permute.xlu0 %1953 }
0x25c4   :  { %2776 = vmatmul.mubr.msk.f32.vlgmr.msra.gmra.mxu0 %vm59_vm0, %v1954_v19 }
0x25c5   :  { %2797 = vmatprep.mubr.msk.f32.mxu0 %vm2974_vm1, %v2973_v3  ;;  %2790 = vmatpush3.msra.mxu0 %v2166_v51 }
0x25c6   :  { %2791 = vmatprep.subr.mxu0 %v2973_v3 }
0x25c7   :  { %2792 = vmatpush3.msra.mxu0 %v2165_v52 }
0x25c8   :  { %2793 = vmatprep.subr.mxu0 %v2973_v3 }
0x25c9   :  { %2794 = vmatpush3.msra.mxu0 %v2164_v53 }
0x25ca   :  { %2795 = vmatprep.subr.mxu0 %v2973_v3 }
0x25cb   :  { %2796 = vmatpush3.msra.mxu0 %v2163_v54 }
0x2684   :  { %v2026_v22 = vpop.f32.mrf.mxu0 }
0x2685   :  { %v2030_v23 = vadd.f32 %v2026_v22, %v1321_v21  ;;  %v2340_v21 = vld [vmem:[%s3554_s10] sm:$0xff]  ;;  %v2341_v22 = vstv %s3544_s0 }
0x2686   :  { %v2777_v24 = vpop.f32.mrf.mxu0 }
0x2687   :  { %2931 = vtanh.f32 %v2030_v23  ;;  %v2420_v26 = vmul.f32 -1.442695, %v2030_v23  ;;  %v2342_v23 = vmul.f32 %v2341_v22, %v2340_v21 }
0x2689   :  { %2933 = vpow2.f32 %v2420_v26 }
0x2694   :  { %v2932_v25 = vpop.eup %2931 }
0x2695   :  { %2040 = vrot.lane.b32.xlu1 %v2932_v25, %s2975_s18 }
0x2696   :  { %v2934_v27 = vpop.eup %2933 }
0x2697   :  { %v2034_v28 = vadd.f32 1.0, %v2934_v27 }
0x2699   :  { %2935 = vrcp.f32 %v2034_v28 }
0x26a6   :  { %v2936_v61 = vpop.eup %2935 }
0x26a7   :  { %v2038_v31 = vmul.f32 %v2936_v61, %v1945_v56 }
0x2707   :  { %v2041_v29 = vpop.permute.xlu1 %2040 }
0x2708   :  { %v2043_v30 = vmul.f32 %v2936_v61, %v2041_v29 }
0x270a   :  { %2045 = vrot.lane.b32.xlu0 %v2043_v30, %s2975_s18 }
0x277c   :  { %v2046_v32 = vpop.permute.xlu0 %2045 }
0x277d   :  { %v2048_v59 = vadd.f32 %v2046_v32, %v2038_v31 }
0x277f   :  { %2937 = vtanh.f32 %v2048_v59 }
0x278c   :  { %v2938_v33 = vpop.eup %2937 }
0x278d   :  { %2051 = vrot.lane.b32.xlu1 %v2938_v33, %s2975_s18 }
0x27ff   :  { %v2052_v34 = vpop.permute.xlu1 %2051 }
0x2800   :  { %v2054_v35 = vmul.f32 %v2936_v61, %v2052_v34 }
0x2802   :  { %2056 = vrot.lane.b32.xlu0 %v2054_v35, %s2976_s4 }
0x2874   :  { %v2057_v36 = vpop.permute.xlu0 %2056 }
0x2875   :  { %2787 = vmatmul.mubr.msk.f32.vlgmr.msra.gmra.mxu1 %vm59_vm0, %v2057_v36 }
0x2876   :  { %2808 = vmatprep.mubr.msk.f32.mxu1 %vm2974_vm1, %v2973_v3  ;;  %2801 = vmatpush3.msra.mxu1 %v2243_v20 }
0x2877   :  { %2802 = vmatprep.subr.mxu1 %v2973_v3 }
0x2878   :  { %2803 = vmatpush3.msra.mxu1 %v2242_v2 }
0x2879   :  { %2804 = vmatprep.subr.mxu1 %v2973_v3 }
0x287a   :  { %2805 = vmatpush3.msra.mxu1 %v2241_v49 }
0x287b   :  { %2806 = vmatprep.subr.mxu1 %v2973_v3  ;;  %v1178_v3 = vadd.f32 %v3377_v17, %v3375_v14 }
0x287c   :  { %2807 = vmatpush3.msra.mxu1 %v2240_v50 }
0x2935   :  { %v2129_v38 = vpop.f32.mrf.mxu1 }
0x2936   :  { %v2133_v39 = vadd.f32 %v2129_v38, %v1326_v37 }
0x2937   :  { %v2788_v40 = vpop.f32.mrf.mxu1 }
0x2938   :  { %2939 = vtanh.f32 %v2133_v39  ;;  %v2422_v42 = vmul.f32 -1.442695, %v2133_v39 }
0x293a   :  { %2941 = vpow2.f32 %v2422_v42 }
0x2945   :  { %v2940_v41 = vpop.eup %2939 }
0x2946   :  { %2143 = vrot.lane.b32.xlu1 %v2940_v41, %s2975_s18 }
0x2947   :  { %v2942_v43 = vpop.eup %2941 }
0x2948   :  { %v2137_v12 = vadd.f32 1.0, %v2942_v43 }
0x294a   :  { %2943 = vrcp.f32 %v2137_v12 }
0x2957   :  { %v2944_v60 = vpop.eup %2943 }
0x2958   :  { %v2141_v46 = vmul.f32 %v2944_v60, %v2048_v59 }
0x29b8   :  { %v2144_v44 = vpop.permute.xlu1 %2143 }
0x29b9   :  { %v2146_v45 = vmul.f32 %v2944_v60, %v2144_v44 }
0x29bb   :  { %2148 = vrot.lane.b32.xlu0 %v2146_v45, %s2975_s18 }
0x2a2d   :  { %v2149_v47 = vpop.permute.xlu0 %2148 }
0x2a2e   :  { %v2151_v48 = vadd.f32 %v2149_v47, %v2141_v46 }
0x2a30   :  { %2945 = vtanh.f32 %v2151_v48 }
0x2a3d   :  { %v2946_v55 = vpop.eup %2945 }
0x2a3e   :  { %2154 = vrot.lane.b32.xlu1 %v2946_v55, %s2975_s18 }
0x2a42   :  { %2245 = vrot.lane.b32.xlu1 %v2151_v48, %s2977_s20  ;;  %s2979_s20 = smov 120  }
0x2ab0   :  { %v2155_v57 = vpop.permute.xlu1 %2154 }
0x2ab1   :  { %v2157_v62 = vmul.f32 %v2944_v60, %v2155_v57 }
0x2ab3   :  { %2159 = vrot.lane.b32.xlu0 %v2157_v62, %s2976_s4  ;;  %s2978_s4 = smov 8  }
0x2ab4   :  { %v2246_v0 = vpop.permute.xlu1 %2245 }
0x2ab5   :  { %2809 = vmatmul.mubr.msk.f32.vlgmr.msra.gmra.mxu1 %vm59_vm0, %v2246_v0 }
0x2b25   :  { %v2160_v63 = vpop.permute.xlu0 %2159 }
0x2b26   :  { %2798 = vmatmul.mubr.msk.f32.vlgmr.msra.gmra.mxu0 %vm59_vm0, %v2160_v63 }
0x2b75   :  { %v2315_v1 = vpop.f32.mrf.mxu1 }
0x2b77   :  { %v2810_v8 = vpop.f32.mrf.mxu1 }
0x2be6   :  { %v2235_v6 = vpop.f32.mrf.mxu0 }
0x2be7   :  { %v2239_v4 = vadd.f32 %v2235_v6, %v1178_v3 }
0x2be8   :  { %v2799_v5 = vpop.f32.mrf.mxu0 }
0x2be9   :  { %v2319_v9 = vadd.f32 %v2315_v1, %v2239_v4 }
0x2beb   :  { %v2327_v58 = vadd.f32 %v2425_v10, %v2319_v9 }
0x2bed   :  { %v2329_v7 = vmin.f32 %v2327_v58, 0.0  ;;  %vm2328_vm2 = vcmp.gt.f32.partialorder %v2327_v58, 0.0 }
0x2bef   :  { %v2330_v11 = vmul.f32 1.442695, %v2329_v7 }
0x2bf1   :  { %2947 = vpow2.f32 %v2330_v11 }
0x2bfe   :  { %v2948_v13 = vpop.eup %2947 }
0x2bff   :  { %v2426_v56 = vadd.f32 -1.0, %v2948_v13 }
0x2c01   :  { %v2333_v15 = vmul.f32 1.6732632, %v2426_v56 }
0x2c03   :  { %v2334_v16 = vsel %vm2328_vm2, %v2327_v58, %v2333_v15 }
0x2c04   :  { %v2335_v18 = vmul.f32 1.050701, %v2334_v16 }
0x2c06   :  { %2350 = vrot.lane.b32.xlu1 %v2335_v18, %s2978_s4  ;;  %v2336_v14 = vmul.f32 0.5, %v2335_v18 }
0x2c08   :  { %v2337_v17 = vmul.f32 1.442695, %v2336_v14 }
0x2c0a   :  { %2949 = vpow2.f32 %v2337_v17 }
0x2c17   :  { %v2950_v19 = vpop.eup %2949 }
0x2c18   :  { %2344 = vrot.lane.b32.xlu0 %v2950_v19, %s2979_s20 }
0x2c78   :  { %v2351_v27 = vpop.permute.xlu1 %2350 }
0x2c8a   :  { %v2345_v24 = vpop.permute.xlu0 %2344 }
0x2c8b   :  { %v2347_v25 = vmul.f32 %v2345_v24, %v2342_v23 }
0x2c8d   :  { %v2348_v26 = vadd.f32 %v2347_v25, %v2335_v18 }
0x2c8f   :  { %v2354_v28 = vsel %vm2353_vm3, %v2348_v26, %v2351_v27 }
0x2c90   :  { %v2356_v61 = vsel %vm2355_vm4, %v2354_v28, %v2351_v27 }
0x2c91   :  { %2358 = vst.msk [vmem:[#allocation6] sm:$0xff] %vm2357_vm5, %v2356_v61 }
0x2c92   :  { %2962 = shalt.err (!%p2959_p4)
}
0x2c93   :  { %2368 = dma.vmem_to_hbm [thread:$0]  %s2366_s21, 128, %s3555_s11, [#allocation7]  }
0x2c94   :  { %2971 = dma.done.wait [#allocation7], 128  }
0x2c95   :  { %2972 = vsyncadd [#allocation7], 4294967168 }
0x2c96   :  { %2372 = vsyncpa [#allocation7], 1 }

</bundles_post_ra>
